<compile_context>
chip_gen: v7x
topology: tpu7x:2x2x1
jax: 0.10.0
libtpu: 0.0.40
codegen_flags: <defaults>
</compile_context>

<pallas_src>
import functools
import math

import jax
import jax.numpy as jnp
from jax.experimental import pallas as pl
from jax.experimental.pallas import tpu as pltpu


def _cdiv(a, b):
    return (a + b - 1) // b


def _round_up(a, b):
    return _cdiv(a, b) * b


# ---------------------------------------------------------------------------
# Fused kernel: the whole MLP on one resident row tile.
#   refs = (x_ref, w0, b0, w1, b1, ..., w{L-1}, b{L-1}, alpha_ref, o_ref)
# Weights/biases have constant block indices -> stay resident in VMEM; the
# layer loop runs entirely on the resident row tile (no intermediate HBM
# round trips).
# ---------------------------------------------------------------------------
def _fused_mlp_kernel(*refs, n_layers, compute_dtype):
    x_ref = refs[0]
    wb_refs = refs[1:1 + 2 * n_layers]
    alpha_ref = refs[1 + 2 * n_layers]
    o_ref = refs[2 + 2 * n_layers]

    alpha = alpha_ref[0] if n_layers > 1 else None    # shared PReLU slope
    h = x_ref[...].astype(compute_dtype)              # in-register cast for MXU
    for layer in range(n_layers):
        w_ref = wb_refs[2 * layer]
        b_ref = wb_refs[2 * layer + 1]
        y = jnp.dot(h, w_ref[...], preferred_element_type=jnp.float32)
        y = y + b_ref[...]                            # bias add in f32
        if layer < n_layers - 1:
            y = jnp.where(y > 0, y, alpha * y)        # PReLU (f32 epilogue)
            # nn.Dropout: identity in eval mode
            h = y.astype(compute_dtype)               # back to compute dtype
        else:
            o_ref[...] = y.astype(o_ref.dtype)        # unpadded (tm, out_feats)


# ---------------------------------------------------------------------------
# One-time parameter preparation (hoisted out of the forward path).
# ---------------------------------------------------------------------------
def prepare_params(weights, biases, compute_dtype=jnp.float32):
    """Pad interior (hidden) dims to 128 lanes and cast ONCE.

    weights[l] is stored [in, out] (transpose of torch Linear.weight [out, in]
    -- transpose when importing real PyTorch checkpoints).  Zero padding of
    hidden dims is exact for Linear + PReLU; in_feats / out_feats stay
    unpadded so x and the output need no wrapper-side copies at call time.
    """
    n_layers = len(weights)
    dims = [weights[0].shape[0]] + [w.shape[1] for w in weights]
    pdims = [dims[0]] + [_round_up(d, 128) for d in dims[1:-1]] + [dims[-1]]
    wb = []
    for layer, (w, b) in enumerate(zip(weights, biases)):
        kp, mp = pdims[layer], pdims[layer + 1]
        wp = jnp.zeros((kp, mp), compute_dtype)
        wp = wp.at[:w.shape[0], :w.shape[1]].set(w.astype(compute_dtype))
        bp = jnp.zeros((1, mp), jnp.float32)
        bp = bp.at[0, :b.shape[0]].set(b.astype(jnp.float32))
        wb += [wp, bp]
    return tuple(wb)


def _vmem_budget_bytes():
    """~85% of physical VMEM (generation aware); conservative fallback."""
    cap = None
    try:
        cap = getattr(pltpu.get_tpu_info(), "vmem_capacity_bytes", None)
    except Exception:
        cap = None
    if not cap:
        cap = 64 << 20                      # v7x-sized fallback, safe everywhere
    return int(0.85 * int(cap))             # ~54 MiB v7x, ~108 MiB v5e/v6e


_PIPELINE_MODE_OK = [hasattr(pl, "Buffered")]   # flip off if Buffered(1) rejected


# ---------------------------------------------------------------------------
# Forward wrapper: no per-call padding/casting, one fused pallas_call.
# ---------------------------------------------------------------------------
def feedforward_net(x, wb_padded, prelu_alpha, *, tm_max=2048):
    """Forward pass. `wb_padded` comes from prepare_params (pad/cast hoisted)."""
    n_layers = len(wb_padded) // 2
    N, in_feats = x.shape
    assert wb_padded[0].shape[0] == in_feats, "x feature dim != first weight in-dim"
    out_feats = wb_padded[-2].shape[1]
    compute_dtype = wb_padded[0].dtype

    # --- VMEM budget and row-tile size derived from real headroom -----------
    budget = _vmem_budget_bytes()
    resident = sum(int(a.size) * int(a.dtype.itemsize) for a in wb_padded)
    interm_cols = sum(w.shape[1] for w in wb_padded[0:-2:2])   # hidden widths
    comp_isz = jnp.dtype(compute_dtype).itemsize
    bytes_per_row = (2 * in_feats * x.dtype.itemsize     # x tile, double buffered
                     + 2 * out_feats * 4                 # out tile, double buffered
                     + interm_cols * (comp_isz + 4))     # h + f32 epilogue temps
    slack = 4 << 20                                      # compiler scratch headroom
    rows_fit = max(8, (budget - slack - 2 * resident) // max(bytes_per_row, 1))
    sub = 16 if x.dtype.itemsize == 2 else 8             # sublane packing of x tile
    tm_cap = int(min(tm_max, rows_fit))
    if N <= tm_cap:
        tm = N            # one full-rows block (legal: equals full array dim)
    else:
        tm = max(sub, (tm_cap // sub) * sub)
    grid = (_cdiv(N, tm),)   # ragged edge block is masked by Pallas; no row padding

    def launch(single_buffer):
        # Resident params: constant block index; single-buffer them when possible.
        wb_kw = {"pipeline_mode": pl.Buffered(1)} if single_buffer else {}
        in_specs = [pl.BlockSpec((tm, in_feats), lambda i: (i, 0))]
        for layer in range(n_layers):
            w, b = wb_padded[2 * layer], wb_padded[2 * layer + 1]
            in_specs.append(pl.BlockSpec(w.shape, lambda i: (0, 0), **wb_kw))
            in_specs.append(pl.BlockSpec(b.shape, lambda i: (0, 0), **wb_kw))
        in_specs.append(pl.BlockSpec(memory_space=pltpu.SMEM))   # PReLU alpha

        buf_mult = 1 if single_buffer else 2
        est = buf_mult * resident + tm * bytes_per_row + slack   # exact-ish need
        vmem_limit = int(min(budget, max(est, 16 << 20)))

        kernel = functools.partial(_fused_mlp_kernel, n_layers=n_layers,
                                   compute_dtype=compute_dtype)
        return pl.pallas_call(
            kernel,
            out_shape=jax.ShapeDtypeStruct((N, out_feats), jnp.float32),
            grid=grid,
            in_specs=in_specs,
            out_specs=pl.BlockSpec((tm, out_feats), lambda i: (i, 0)),
            compiler_params=pltpu.CompilerParams(
                dimension_semantics=("parallel",),
                vmem_limit_bytes=vmem_limit),
        )(x, *wb_padded, prelu_alpha)

    if _PIPELINE_MODE_OK[0]:
        try:
            return launch(single_buffer=True)
        except Exception:
            _PIPELINE_MODE_OK[0] = False   # JAX without Buffered(1) support: retry
    return launch(single_buffer=False)


# ---------------------------------------------------------------------------
# Parameter construction (matches FeedForwardNet.__init__ / reset_parameters)
# ---------------------------------------------------------------------------
def init_feedforward_params(key, in_feats, hidden, out_feats, n_layers):
    if n_layers == 1:
        dims = [(in_feats, out_feats)]
    else:
        dims = [(in_feats, hidden)]
        dims += [(hidden, hidden)] * (n_layers - 2)
        dims += [(hidden, out_feats)]

    gain = math.sqrt(2.0)  # nn.init.calculate_gain('relu')
    weights, biases = [], []
    for (fan_in, fan_out) in dims:
        key, sub = jax.random.split(key)
        bound = gain * math.sqrt(6.0 / (fan_in + fan_out))  # xavier_uniform_
        # stored as [in, out] (transpose of torch's [out, in]); the xavier bound
        # is symmetric in fan_in/fan_out so the distribution is identical.
        w = jax.random.uniform(sub, (fan_in, fan_out), jnp.float32,
                               minval=-bound, maxval=bound)
        b = jnp.zeros((fan_out,), jnp.float32)               # zeros_(bias)
        weights.append(w)
        biases.append(b)

    prelu_alpha = jnp.full((1,), 0.25, jnp.float32)  # nn.PReLU default init
    return weights, biases, prelu_alpha


# ---------------------------------------------------------------------------
if __name__ == "__main__":
    in_feats, hidden, out_feats, n_layers = 32, 64, 16, 3
    batch = 100  # exercises masked row stores and (below) a multi-step grid

    key = jax.random.PRNGKey(0)
    key, xk = jax.random.split(key)
    x = jax.random.normal(xk, (batch, in_feats), jnp.float32)

    weights, biases, prelu_alpha = init_feedforward_params(
        key, in_feats, hidden, out_feats, n_layers)

    # pure-JAX reference (eval mode)
    ref = x
    for i, (w, b) in enumerate(zip(weights, biases)):
        ref = ref @ w + b
        if i < n_layers - 1:
            ref = jnp.where(ref > 0, ref, prelu_alpha[0] * ref)

    # f32 fused kernel (single row tile, grid = 1, no wrapper-side copies)
    wb_f32 = prepare_params(weights, biases, jnp.float32)
    out = jax.block_until_ready(feedforward_net(x, wb_f32, prelu_alpha))
    assert out.shape == (batch, out_feats)
    assert jnp.allclose(out, ref, atol=1e-4, rtol=1e-4)

    # multi-step grid + masked (ragged) edge block
    out_tiled = jax.block_until_ready(
        feedforward_net(x, wb_f32, prelu_alpha, tm_max=32))
    assert jnp.allclose(out_tiled, ref, atol=1e-4, rtol=1e-4)

    # bf16 compute path (MXU-native on v5e/v6e/v7x); f32 epilogue, loose tol
    wb_bf16 = prepare_params(weights, biases, jnp.bfloat16)
    out_bf16 = jax.block_until_ready(feedforward_net(x, wb_bf16, prelu_alpha))
    assert out_bf16.shape == (batch, out_feats)
    rel_err = jnp.max(jnp.abs(out_bf16 - ref)) / (jnp.max(jnp.abs(ref)) + 1e-6)
    assert rel_err < 5e-2

    # single-layer config (no PReLU / dropout path)
    w1, b1, a1 = init_feedforward_params(jax.random.PRNGKey(1),
                                         in_feats, hidden, out_feats, 1)
    wb1 = prepare_params(w1, b1, jnp.float32)
    ref1 = x @ w1[0] + b1[0]
    out1 = jax.block_until_ready(feedforward_net(x, wb1, a1))
    assert jnp.allclose(out1, ref1, atol=1e-4, rtol=1e-4)

    print("KERNEL_OK")
</pallas_src>

<mosaic_0001>
module attributes {stable_mosaic.version = 11 : i64} {
  func.func @_fused_mlp_kernel(%arg0: i32, %arg1: memref<100x32xf32, #tpu.memory_space<vmem>>, %arg2: memref<32x128xf32, #tpu.memory_space<vmem>>, %arg3: memref<1x128xf32, #tpu.memory_space<vmem>>, %arg4: memref<128x128xf32, #tpu.memory_space<vmem>>, %arg5: memref<1x128xf32, #tpu.memory_space<vmem>>, %arg6: memref<128x16xf32, #tpu.memory_space<vmem>>, %arg7: memref<1x16xf32, #tpu.memory_space<vmem>>, %arg8: memref<1xf32, #tpu.memory_space<smem>>, %arg9: memref<100x16xf32, #tpu.memory_space<vmem>>) attributes {dimension_semantics = [#tpu.dimension_semantics<parallel>], iteration_bounds = array<i64: 1>, scalar_prefetch = 0 : i64, scratch_operands = 0 : i64, tpu.core_type = #tpu.core_type<tc>, window_params = [{transform_indices = @transform_0, window_bounds = array<i64: 100, 32>}, {pipeline_mode = #tpu.pipeline_mode<synchronous>, transform_indices = @transform_1, window_bounds = array<i64: 32, 128>}, {pipeline_mode = #tpu.pipeline_mode<synchronous>, transform_indices = @transform_2, window_bounds = array<i64: 1, 128>}, {pipeline_mode = #tpu.pipeline_mode<synchronous>, transform_indices = @transform_3, window_bounds = array<i64: 128, 128>}, {pipeline_mode = #tpu.pipeline_mode<synchronous>, transform_indices = @transform_4, window_bounds = array<i64: 1, 128>}, {pipeline_mode = #tpu.pipeline_mode<synchronous>, transform_indices = @transform_5, window_bounds = array<i64: 128, 16>}, {pipeline_mode = #tpu.pipeline_mode<synchronous>, transform_indices = @transform_6, window_bounds = array<i64: 1, 16>}, {transform_indices = @transform_7, window_bounds = array<i64: 1>}, {transform_indices = @transform_8, window_bounds = array<i64: 100, 16>}]} {
    %c0 = arith.constant 0 : index
    %0 = memref.load %arg8[%c0] : memref<1xf32, #tpu.memory_space<smem>>
    %c0_0 = arith.constant 0 : index
    %c0_1 = arith.constant 0 : index
    %1 = vector.load %arg1[%c0_0, %c0_1] : memref<100x32xf32, #tpu.memory_space<vmem>>, vector<100x32xf32>
    %c0_2 = arith.constant 0 : index
    %c0_3 = arith.constant 0 : index
    %2 = vector.load %arg2[%c0_2, %c0_3] : memref<32x128xf32, #tpu.memory_space<vmem>>, vector<32x128xf32>
    %cst = arith.constant dense<0.000000e+00> : vector<100x128xf32>
    %3 = tpu.matmul %1, %2, %cst {dimension_numbers = #tpu.dot_dimension_numbers<[1], [0], [0], [1], [0, 0, 1, 1], [], []>} : vector<100x32xf32>, vector<32x128xf32>, vector<100x128xf32> -> vector<100x128xf32>
    %c0_4 = arith.constant 0 : index
    %c0_5 = arith.constant 0 : index
    %4 = vector.load %arg3[%c0_4, %c0_5] : memref<1x128xf32, #tpu.memory_space<vmem>>, vector<1x128xf32>
    %5 = vector.broadcast %4 : vector<1x128xf32> to vector<100x128xf32>
    %6 = arith.addf %3, %5 : vector<100x128xf32>
    %cst_6 = arith.constant 0.000000e+00 : f32
    %7 = vector.broadcast %cst_6 : f32 to vector<100x128xf32>
    %8 = arith.cmpf ogt, %6, %7 : vector<100x128xf32>
    %9 = vector.broadcast %0 : f32 to vector<100x128xf32>
    %10 = arith.mulf %9, %6 : vector<100x128xf32>
    %11 = arith.select %8, %6, %10 : vector<100x128xi1>, vector<100x128xf32>
    %c0_7 = arith.constant 0 : index
    %c0_8 = arith.constant 0 : index
    %12 = vector.load %arg4[%c0_7, %c0_8] : memref<128x128xf32, #tpu.memory_space<vmem>>, vector<128x128xf32>
    %cst_9 = arith.constant dense<0.000000e+00> : vector<100x128xf32>
    %13 = tpu.matmul %11, %12, %cst_9 {dimension_numbers = #tpu.dot_dimension_numbers<[1], [0], [0], [1], [0, 0, 1, 1], [], []>} : vector<100x128xf32>, vector<128x128xf32>, vector<100x128xf32> -> vector<100x128xf32>
    %c0_10 = arith.constant 0 : index
    %c0_11 = arith.constant 0 : index
    %14 = vector.load %arg5[%c0_10, %c0_11] : memref<1x128xf32, #tpu.memory_space<vmem>>, vector<1x128xf32>
    %15 = vector.broadcast %14 : vector<1x128xf32> to vector<100x128xf32>
    %16 = arith.addf %13, %15 : vector<100x128xf32>
    %cst_12 = arith.constant 0.000000e+00 : f32
    %17 = vector.broadcast %cst_12 : f32 to vector<100x128xf32>
    %18 = arith.cmpf ogt, %16, %17 : vector<100x128xf32>
    %19 = vector.broadcast %0 : f32 to vector<100x128xf32>
    %20 = arith.mulf %19, %16 : vector<100x128xf32>
    %21 = arith.select %18, %16, %20 : vector<100x128xi1>, vector<100x128xf32>
    %c0_13 = arith.constant 0 : index
    %c0_14 = arith.constant 0 : index
    %22 = vector.load %arg6[%c0_13, %c0_14] : memref<128x16xf32, #tpu.memory_space<vmem>>, vector<128x16xf32>
    %cst_15 = arith.constant dense<0.000000e+00> : vector<100x16xf32>
    %23 = tpu.matmul %21, %22, %cst_15 {dimension_numbers = #tpu.dot_dimension_numbers<[1], [0], [0], [1], [0, 0, 1, 1], [], []>} : vector<100x128xf32>, vector<128x16xf32>, vector<100x16xf32> -> vector<100x16xf32>
    %c0_16 = arith.constant 0 : index
    %c0_17 = arith.constant 0 : index
    %24 = vector.load %arg7[%c0_16, %c0_17] : memref<1x16xf32, #tpu.memory_space<vmem>>, vector<1x16xf32>
    %25 = vector.broadcast %24 : vector<1x16xf32> to vector<100x16xf32>
    %26 = arith.addf %23, %25 : vector<100x16xf32>
    %c0_18 = arith.constant 0 : index
    %c0_19 = arith.constant 0 : index
    %27 = vector.load %arg9[%c0_18, %c0_19] : memref<100x16xf32, #tpu.memory_space<vmem>>, vector<100x16xf32>
    tpu.vector_store %arg9[%c0_18, %c0_19], %26 {strides = array<i32>} : memref<100x16xf32, #tpu.memory_space<vmem>>, vector<100x16xf32>,
    return
  }
  func.func @transform_0(%arg0: i32) -> (i32, i32) {
    %c0_i32 = arith.constant 0 : i32
    %c0_i32_0 = arith.constant 0 : i32
    return %arg0, %c0_i32 : i32, i32
  }
  func.func @transform_1(%arg0: i32) -> (i32, i32) {
    %c0_i32 = arith.constant 0 : i32
    %c0_i32_0 = arith.constant 0 : i32
    %c0_i32_1 = arith.constant 0 : i32
    return %c0_i32, %c0_i32_0 : i32, i32
  }
  func.func @transform_2(%arg0: i32) -> (i32, i32) {
    %c0_i32 = arith.constant 0 : i32
    %c0_i32_0 = arith.constant 0 : i32
    %c0_i32_1 = arith.constant 0 : i32
    return %c0_i32, %c0_i32_0 : i32, i32
  }
  func.func @transform_3(%arg0: i32) -> (i32, i32) {
    %c0_i32 = arith.constant 0 : i32
    %c0_i32_0 = arith.constant 0 : i32
    %c0_i32_1 = arith.constant 0 : i32
    return %c0_i32, %c0_i32_0 : i32, i32
  }
  func.func @transform_4(%arg0: i32) -> (i32, i32) {
    %c0_i32 = arith.constant 0 : i32
    %c0_i32_0 = arith.constant 0 : i32
    %c0_i32_1 = arith.constant 0 : i32
    return %c0_i32, %c0_i32_0 : i32, i32
  }
  func.func @transform_5(%arg0: i32) -> (i32, i32) {
    %c0_i32 = arith.constant 0 : i32
    %c0_i32_0 = arith.constant 0 : i32
    %c0_i32_1 = arith.constant 0 : i32
    return %c0_i32, %c0_i32_0 : i32, i32
  }
  func.func @transform_6(%arg0: i32) -> (i32, i32) {
    %c0_i32 = arith.constant 0 : i32
    %c0_i32_0 = arith.constant 0 : i32
    %c0_i32_1 = arith.constant 0 : i32
    return %c0_i32, %c0_i32_0 : i32, i32
  }
  func.func @transform_7(%arg0: i32) -> i32 {
    %c0_i32 = arith.constant 0 : i32
    %c0_i32_0 = arith.constant 0 : i32
    return %c0_i32 : i32
  }
  func.func @transform_8(%arg0: i32) -> (i32, i32) {
    %c0_i32 = arith.constant 0 : i32
    %c0_i32_0 = arith.constant 0 : i32
    return %arg0, %c0_i32 : i32, i32
  }
}

module attributes {stable_mosaic.version = 11 : i64} {
  func.func @_fused_mlp_kernel(%arg0: i32, %arg1: memref<100x32xf32, #tpu.memory_space<vmem>>, %arg2: memref<32x128xf32, #tpu.memory_space<vmem>>, %arg3: memref<1x128xf32, #tpu.memory_space<vmem>>, %arg4: memref<128x128xf32, #tpu.memory_space<vmem>>, %arg5: memref<1x128xf32, #tpu.memory_space<vmem>>, %arg6: memref<128x16xf32, #tpu.memory_space<vmem>>, %arg7: memref<1x16xf32, #tpu.memory_space<vmem>>, %arg8: memref<1xf32, #tpu.memory_space<smem>>, %arg9: memref<100x16xf32, #tpu.memory_space<vmem>>) attributes {dimension_semantics = [#tpu.dimension_semantics<parallel>], iteration_bounds = array<i64: 1>, scalar_prefetch = 0 : i64, scratch_operands = 0 : i64, tpu.core_type = #tpu.core_type<tc>, window_params = [{transform_indices = @transform_0, window_bounds = array<i64: 100, 32>}, {pipeline_mode = #tpu.pipeline_mode<synchronous>, transform_indices = @transform_1, window_bounds = array<i64: 32, 128>}, {pipeline_mode = #tpu.pipeline_mode<synchronous>, transform_indices = @transform_2, window_bounds = array<i64: 1, 128>}, {pipeline_mode = #tpu.pipeline_mode<synchronous>, transform_indices = @transform_3, window_bounds = array<i64: 128, 128>}, {pipeline_mode = #tpu.pipeline_mode<synchronous>, transform_indices = @transform_4, window_bounds = array<i64: 1, 128>}, {pipeline_mode = #tpu.pipeline_mode<synchronous>, transform_indices = @transform_5, window_bounds = array<i64: 128, 16>}, {pipeline_mode = #tpu.pipeline_mode<synchronous>, transform_indices = @transform_6, window_bounds = array<i64: 1, 16>}, {transform_indices = @transform_7, window_bounds = array<i64: 1>}, {transform_indices = @transform_8, window_bounds = array<i64: 100, 16>}]} {
    %c0 = arith.constant 0 : index
    %0 = memref.load %arg8[%c0] : memref<1xf32, #tpu.memory_space<smem>>
    %c0_0 = arith.constant 0 : index
    %c0_1 = arith.constant 0 : index
    %1 = vector.load %arg1[%c0_0, %c0_1] : memref<100x32xf32, #tpu.memory_space<vmem>>, vector<100x32xf32>
    %c0_2 = arith.constant 0 : index
    %c0_3 = arith.constant 0 : index
    %2 = vector.load %arg2[%c0_2, %c0_3] : memref<32x128xf32, #tpu.memory_space<vmem>>, vector<32x128xf32>
    %cst = arith.constant dense<0.000000e+00> : vector<100x128xf32>
    %3 = tpu.matmul %1, %2, %cst {dimension_numbers = #tpu.dot_dimension_numbers<[1], [0], [0], [1], [0, 0, 1, 1], [], []>} : vector<100x32xf32>, vector<32x128xf32>, vector<100x128xf32> -> vector<100x128xf32>
    %c0_4 = arith.constant 0 : index
    %c0_5 = arith.constant 0 : index
    %4 = vector.load %arg3[%c0_4, %c0_5] : memref<1x128xf32, #tpu.memory_space<vmem>>, vector<1x128xf32>
    %5 = vector.broadcast %4 : vector<1x128xf32> to vector<100x128xf32>
    %6 = arith.addf %3, %5 : vector<100x128xf32>
    %cst_6 = arith.constant 0.000000e+00 : f32
    %7 = vector.broadcast %cst_6 : f32 to vector<100x128xf32>
    %8 = arith.cmpf ogt, %6, %7 : vector<100x128xf32>
    %9 = vector.broadcast %0 : f32 to vector<100x128xf32>
    %10 = arith.mulf %9, %6 : vector<100x128xf32>
    %11 = arith.select %8, %6, %10 : vector<100x128xi1>, vector<100x128xf32>
    %c0_7 = arith.constant 0 : index
    %c0_8 = arith.constant 0 : index
    %12 = vector.load %arg4[%c0_7, %c0_8] : memref<128x128xf32, #tpu.memory_space<vmem>>, vector<128x128xf32>
    %cst_9 = arith.constant dense<0.000000e+00> : vector<100x128xf32>
    %13 = tpu.matmul %11, %12, %cst_9 {dimension_numbers = #tpu.dot_dimension_numbers<[1], [0], [0], [1], [0, 0, 1, 1], [], []>} : vector<100x128xf32>, vector<128x128xf32>, vector<100x128xf32> -> vector<100x128xf32>
    %c0_10 = arith.constant 0 : index
    %c0_11 = arith.constant 0 : index
    %14 = vector.load %arg5[%c0_10, %c0_11] : memref<1x128xf32, #tpu.memory_space<vmem>>, vector<1x128xf32>
    %15 = vector.broadcast %14 : vector<1x128xf32> to vector<100x128xf32>
    %16 = arith.addf %13, %15 : vector<100x128xf32>
    %cst_12 = arith.constant 0.000000e+00 : f32
    %17 = vector.broadcast %cst_12 : f32 to vector<100x128xf32>
    %18 = arith.cmpf ogt, %16, %17 : vector<100x128xf32>
    %19 = vector.broadcast %0 : f32 to vector<100x128xf32>
    %20 = arith.mulf %19, %16 : vector<100x128xf32>
    %21 = arith.select %18, %16, %20 : vector<100x128xi1>, vector<100x128xf32>
    %c0_13 = arith.constant 0 : index
    %c0_14 = arith.constant 0 : index
    %22 = vector.load %arg6[%c0_13, %c0_14] : memref<128x16xf32, #tpu.memory_space<vmem>>, vector<128x16xf32>
    %cst_15 = arith.constant dense<0.000000e+00> : vector<100x16xf32>
    %23 = tpu.matmul %21, %22, %cst_15 {dimension_numbers = #tpu.dot_dimension_numbers<[1], [0], [0], [1], [0, 0, 1, 1], [], []>} : vector<100x128xf32>, vector<128x16xf32>, vector<100x16xf32> -> vector<100x16xf32>
    %c0_16 = arith.constant 0 : index
    %c0_17 = arith.constant 0 : index
    %24 = vector.load %arg7[%c0_16, %c0_17] : memref<1x16xf32, #tpu.memory_space<vmem>>, vector<1x16xf32>
    %25 = vector.broadcast %24 : vector<1x16xf32> to vector<100x16xf32>
    %26 = arith.addf %23, %25 : vector<100x16xf32>
    %c0_18 = arith.constant 0 : index
    %c0_19 = arith.constant 0 : index
    %27 = vector.load %arg9[%c0_18, %c0_19] : memref<100x16xf32, #tpu.memory_space<vmem>>, vector<100x16xf32>
    tpu.vector_store %arg9[%c0_18, %c0_19], %26 {strides = array<i32>} : memref<100x16xf32, #tpu.memory_space<vmem>>, vector<100x16xf32>,
    return
  }
  func.func @transform_0(%arg0: i32) -> (i32, i32) {
    %c0_i32 = arith.constant 0 : i32
    %c0_i32_0 = arith.constant 0 : i32
    return %arg0, %c0_i32 : i32, i32
  }
  func.func @transform_1(%arg0: i32) -> (i32, i32) {
    %c0_i32 = arith.constant 0 : i32
    %c0_i32_0 = arith.constant 0 : i32
    %c0_i32_1 = arith.constant 0 : i32
    return %c0_i32, %c0_i32_0 : i32, i32
  }
  func.func @transform_2(%arg0: i32) -> (i32, i32) {
    %c0_i32 = arith.constant 0 : i32
    %c0_i32_0 = arith.constant 0 : i32
    %c0_i32_1 = arith.constant 0 : i32
    return %c0_i32, %c0_i32_0 : i32, i32
  }
  func.func @transform_3(%arg0: i32) -> (i32, i32) {
    %c0_i32 = arith.constant 0 : i32
    %c0_i32_0 = arith.constant 0 : i32
    %c0_i32_1 = arith.constant 0 : i32
    return %c0_i32, %c0_i32_0 : i32, i32
  }
  func.func @transform_4(%arg0: i32) -> (i32, i32) {
    %c0_i32 = arith.constant 0 : i32
    %c0_i32_0 = arith.constant 0 : i32
    %c0_i32_1 = arith.constant 0 : i32
    return %c0_i32, %c0_i32_0 : i32, i32
  }
  func.func @transform_5(%arg0: i32) -> (i32, i32) {
    %c0_i32 = arith.constant 0 : i32
    %c0_i32_0 = arith.constant 0 : i32
    %c0_i32_1 = arith.constant 0 : i32
    return %c0_i32, %c0_i32_0 : i32, i32
  }
  func.func @transform_6(%arg0: i32) -> (i32, i32) {
    %c0_i32 = arith.constant 0 : i32
    %c0_i32_0 = arith.constant 0 : i32
    %c0_i32_1 = arith.constant 0 : i32
    return %c0_i32, %c0_i32_0 : i32, i32
  }
  func.func @transform_7(%arg0: i32) -> i32 {
    %c0_i32 = arith.constant 0 : i32
    %c0_i32_0 = arith.constant 0 : i32
    return %c0_i32 : i32
  }
  func.func @transform_8(%arg0: i32) -> (i32, i32) {
    %c0_i32 = arith.constant 0 : i32
    %c0_i32_0 = arith.constant 0 : i32
    return %arg0, %c0_i32 : i32, i32
  }
}

</mosaic_0001>

<bundles_post_ra>
// kernel: tpu_custom_call.1
= control target key start
LH: loop header
LB: loop body
LE: loop exit
PB: predicated region body
PF: predicated region fallthrough
CT: control target
= control target key end

     0   :  { %v970_v0 = vmov 0.0|0.0   ;;  %vm971_vm0 = vmmov 0   ;;  %v972_v4 = vmov 0.0   ;;  %vm55_vm1 = vcmask 261120   ;;  %s1403_s1 = inlined_call_operand.vmem [shape: f32[32,128], index: 1, kind: input, shape index: {}]   ;;  %s1404_s3 = inlined_call_operand.vmem [shape: f32[128,128], index: 3, kind: input, shape index: {}]   ;;  %s1405_s0 = inlined_call_operand.vmem [shape: f32[100,32], index: 0, kind: input, shape index: {}]   ;;  %s1406_s5 = inlined_call_operand.vmem [shape: f32[128,16], index: 5, kind: input, shape index: {}]   ;;  %s1407_s2 = inlined_call_operand.vmem [shape: f32[1,128], index: 2, kind: input, shape index: {}]   ;;  %s1408_s7 = inlined_call_operand.<no memory space> [shape: f32[1], index: 7, kind: input, shape index: {}]   ;;  %s1409_s4 = inlined_call_operand.vmem [shape: f32[1,128], index: 4, kind: input, shape index: {}]   ;;  %s1410_s6 = inlined_call_operand.vmem [shape: f32[1,16], index: 6, kind: input, shape index: {}]   ;;  %s1411_s8 = inlined_call_operand.vmem [shape: f32[100,16], index: 8, kind: output, shape index: {}]  }
   0x1   :  { %909 = vmatprep.subr.bf16.mxu0 %v970_v0  ;;  %v44_v1 = vld [vmem:[%s1403_s1] sm:$0xff]  ;;  %v45_v2 = vld [vmem:[%s1403_s1 + $0x8] sm:$0xff]  ;;  %v46_v3 = vld [vmem:[%s1403_s1 + $0x10] sm:$0xff]  ;;  %728 = vmatprep.mubr.msk.f32.mxu0 %vm971_vm0, %v972_v4 }
   0x2   :  { %v910_v5 = vpack.c.bf16 %v45_v2, %v44_v1  ;;  %v47_v6 = vld [vmem:[%s1403_s1 + $0x18] sm:$0xff]  ;;  %963 = vmatprep.subr.bf16.mxu1 %v970_v0  ;;  %752 = vmatprep.mubr.msk.f32.mxu1 %vm971_vm0, %v972_v4  ;;  %v265_v8 = vld [vmem:[%s1404_s3] sm:$0xff]  ;;  %v266_v9 = vld [vmem:[%s1404_s3 + $0x8] sm:$0xff] }
   0x3   :  { %v913_v7 = vpack.c.bf16 %v47_v6, %v46_v3  ;;  %v31_v10 = vld [vmem:[%s1405_s0] sm:$0xff]  ;;  %v916_v12 = vpack.c.bf16 %v266_v9, %v265_v8  ;;  %v267_v13 = vld [vmem:[%s1404_s3 + $0x10] sm:$0xff]  ;;  %v268_v14 = vld [vmem:[%s1404_s3 + $0x18] sm:$0xff]  ;;  %v1230_v6 = vstv %s1408_s7 }
   0x4   :  { %911 = vmatpush3.bf16.msra.mxu0 %v910_v5  ;;  %965 = vmatpush3.bf16.msra.mxu1 %v910_v5  ;;  %v39_v11 = vld [vmem:[%s1405_s0 + $0x40] sm:$0xff]  ;;  %v32_v15 = vld [vmem:[%s1405_s0 + $0x8] sm:$0xff]  ;;  %v919_v17 = vpack.c.bf16 %v268_v14, %v267_v13  ;;  %v33_v20 = vld [vmem:[%s1405_s0 + $0x10] sm:$0xff] }
   0x5   :  { %912 = vmatprep.subr.bf16.mxu0 %v970_v0  ;;  %964 = vmatprep.subr.bf16.mxu1 %v970_v0  ;;  %v40_v16 = vld [vmem:[%s1405_s0 + $0x48] sm:$0xff]  ;;  %v269_v18 = vld [vmem:[%s1404_s3 + $0x20] sm:$0xff]  ;;  %v41_v21 = vld [vmem:[%s1405_s0 + $0x50] sm:$0xff] }
   0x6   :  { %v270_v19 = vld [vmem:[%s1404_s3 + $0x28] sm:$0xff]  ;;  %v271_v23 = vld [vmem:[%s1404_s3 + $0x30] sm:$0xff]  ;;  %v272_v24 = vld [vmem:[%s1404_s3 + $0x38] sm:$0xff] }
   0x7   :  { %v922_v22 = vpack.c.bf16 %v270_v19, %v269_v18  ;;  %v34_v25 = vld [vmem:[%s1405_s0 + $0x18] sm:$0xff]  ;;  %v925_v27 = vpack.c.bf16 %v272_v24, %v271_v23  ;;  %v273_v28 = vld [vmem:[%s1404_s3 + $0x40] sm:$0xff]  ;;  %v274_v29 = vld [vmem:[%s1404_s3 + $0x48] sm:$0xff] }
   0x8   :  { %914 = vmatpush3.bf16.msra.mxu0 %v913_v7  ;;  %966 = vmatpush3.bf16.msra.mxu1 %v913_v7  ;;  %v42_v26 = vld [vmem:[%s1405_s0 + $0x58] sm:$0xff]  ;;  %v35_v30 = vld [vmem:[%s1405_s0 + $0x20] sm:$0xff]  ;;  %v928_v32 = vpack.c.bf16 %v274_v29, %v273_v28  ;;  %v275_v33 = vld [vmem:[%s1404_s3 + $0x50] sm:$0xff] }
   0x9   :  { %915 = vmatprep.subr.bf16.mxu1 %v970_v0  ;;  %939 = vmatprep.subr.bf16.mxu0 %v970_v0  ;;  %v43_v31 = vld [vmem:[%s1405_s0 + $0x60] sm:$0xf]  ;;  %v276_v34 = vld [vmem:[%s1404_s3 + $0x58] sm:$0xff]  ;;  %v36_v35 = vld [vmem:[%s1405_s0 + $0x28] sm:$0xff] }
   0xa   :  { %v931_v36 = vpack.c.bf16 %v276_v34, %v275_v33  ;;  %v277_v37 = vld [vmem:[%s1404_s3 + $0x60] sm:$0xff]  ;;  %v278_v38 = vld [vmem:[%s1404_s3 + $0x68] sm:$0xff]  ;;  %v37_v39 = vld [vmem:[%s1405_s0 + $0x30] sm:$0xff] }
   0xb   :  { %729 = vmatmul.mubr.msk.f32.vlgmr.msra.gmra.mrb[0].mxu0 %vm55_vm1, %v31_v10  ;;  %753 = vmatmul.mubr.msk.f32.vlgmr.msra.gmra.mrb[0].mxu1 %vm55_vm1, %v39_v11  ;;  %v934_v40 = vpack.c.bf16 %v278_v38, %v277_v37  ;;  %v38_v41 = vld [vmem:[%s1405_s0 + $0x38] sm:$0xff]  ;;  %v279_v42 = vld [vmem:[%s1404_s3 + $0x70] sm:$0xff]  ;;  %v457_v45 = vld [vmem:[%s1406_s5] sm:$0xff] }
   0xc   :  { %731 = vmatprep.mubr.msk.f32.mxu0 %vm971_vm0, %v972_v4  ;;  %755 = vmatprep.mubr.msk.f32.mxu1 %vm971_vm0, %v972_v4  ;;  %v280_v43 = vld [vmem:[%s1404_s3 + $0x78] sm:$0xff]  ;;  %v458_v46 = vld [vmem:[%s1406_s5 + $0x8] sm:$0xff]  ;;  %v459_v47 = vld [vmem:[%s1406_s5 + $0x10] sm:$0xff] }
   0xd   :  { %917 = vmatpush3.bf16.msra.mxu1 %v916_v12  ;;  %v937_v44 = vpack.c.bf16 %v280_v43, %v279_v42  ;;  %v940_v48 = vpack.c.bf16 %v458_v46, %v457_v45  ;;  %v460_v49 = vld [vmem:[%s1406_s5 + $0x18] sm:$0xff]  ;;  %v461_v51 = vld [vmem:[%s1406_s5 + $0x20] sm:$0xff]  ;;  %v462_v52 = vld [vmem:[%s1406_s5 + $0x28] sm:$0xff] }
   0xe   :  { %918 = vmatprep.subr.bf16.mxu1 %v970_v0  ;;  %v943_v50 = vpack.c.bf16 %v460_v49, %v459_v47  ;;  %v946_v53 = vpack.c.bf16 %v462_v52, %v461_v51  ;;  %v463_v54 = vld [vmem:[%s1406_s5 + $0x30] sm:$0xff]  ;;  %v464_v55 = vld [vmem:[%s1406_s5 + $0x38] sm:$0xff]  ;;  %v465_v57 = vld [vmem:[%s1406_s5 + $0x40] sm:$0xff] }
   0xf   :  { %732 = vmatmul.mubr.msk.f32.gmra.mrb[2].mxu0 %vm55_vm1, %v32_v15  ;;  %756 = vmatmul.mubr.msk.f32.gmra.mrb[2].mxu1 %vm55_vm1, %v40_v16  ;;  %v949_v56 = vpack.c.bf16 %v464_v55, %v463_v54  ;;  %v466_v58 = vld [vmem:[%s1406_s5 + $0x48] sm:$0xff]  ;;  %v467_v60 = vld [vmem:[%s1406_s5 + $0x50] sm:$0xff]  ;;  %v468_v61 = vld [vmem:[%s1406_s5 + $0x58] sm:$0xff] }
  0x10   :  { %734 = vmatprep.mubr.msk.f32.mxu0 %vm971_vm0, %v972_v4  ;;  %758 = vmatprep.mubr.msk.f32.mxu1 %vm971_vm0, %v972_v4  ;;  %v952_v59 = vpack.c.bf16 %v466_v58, %v465_v57  ;;  %v955_v62 = vpack.c.bf16 %v468_v61, %v467_v60  ;;  %v469_v63 = vld [vmem:[%s1406_s5 + $0x60] sm:$0xff]  ;;  %v470_v1 = vld [vmem:[%s1406_s5 + $0x68] sm:$0xff] }
  0x11   :  { %920 = vmatpush3.bf16.msra.mxu1 %v919_v17  ;;  %941 = vmatpush3.bf16.msra.mxu0 %v940_v48  ;;  %v958_v2 = vpack.c.bf16 %v470_v1, %v469_v63  ;;  %v1225_v3 = vld [vmem:[%s1407_s2] ss:$0 sm:$0xff] }
  0x12   :  { %921 = vmatprep.subr.bf16.mxu1 %v970_v0  ;;  %942 = vmatprep.subr.bf16.mxu0 %v970_v0 }
  0x13   :  { %735 = vmatmul.mubr.msk.f32.gmra.mrb[4].mxu0 %vm55_vm1, %v33_v20  ;;  %759 = vmatmul.mubr.msk.f32.gmra.mrb[4].mxu1 %vm55_vm1, %v41_v21 }
  0x14   :  { %737 = vmatprep.mubr.msk.f32.mxu0 %vm971_vm0, %v972_v4  ;;  %761 = vmatprep.mubr.msk.f32.mxu1 %vm971_vm0, %v972_v4 }
  0x15   :  { %923 = vmatpush3.bf16.msra.mxu1 %v922_v22  ;;  %944 = vmatpush3.bf16.msra.mxu0 %v943_v50 }
  0x16   :  { %924 = vmatprep.subr.bf16.mxu1 %v970_v0  ;;  %945 = vmatprep.subr.bf16.mxu0 %v970_v0 }
  0x17   :  { %738 = vmatmul.mubr.msk.f32.gmra.mrb[6].mxu0 %vm55_vm1, %v34_v25  ;;  %762 = vmatmul.mubr.msk.f32.gmra.mrb[6].mxu1 %vm55_vm1, %v42_v26 }
  0x18   :  { %740 = vmatprep.mubr.msk.f32.mxu0 %vm971_vm0, %v972_v4  ;;  %764 = vmatprep.mubr.msk.f32.mxu1 %vm971_vm0, %v972_v4 }
  0x19   :  { %926 = vmatpush3.bf16.msra.mxu1 %v925_v27  ;;  %947 = vmatpush3.bf16.msra.mxu0 %v946_v53 }
  0x1a   :  { %927 = vmatprep.subr.bf16.mxu1 %v970_v0  ;;  %948 = vmatprep.subr.bf16.mxu0 %v970_v0 }
  0x1b   :  { %741 = vmatmul.mubr.msk.f32.gmra.mrb[8].mxu0 %vm55_vm1, %v35_v30  ;;  %765 = vmatmul.mubr.msk.f32.gmra.mrb[8].mxu1 %vm55_vm1, %v43_v31 }
  0x1c   :  { %743 = vmatprep.mubr.msk.f32.mxu0 %vm971_vm0, %v972_v4  ;;  %799 = vmatprep.mubr.msk.f32.mxu1 %vm971_vm0, %v972_v4 }
  0x1d   :  { %929 = vmatpush3.bf16.msra.mxu1 %v928_v32  ;;  %950 = vmatpush3.bf16.msra.mxu0 %v949_v56 }
  0x1e   :  { %930 = vmatprep.subr.bf16.mxu1 %v970_v0  ;;  %951 = vmatprep.subr.bf16.mxu0 %v970_v0 }
  0x1f   :  { %744 = vmatmul.mubr.msk.f32.gmra.mrb[10].mxu0 %vm55_vm1, %v36_v35 }
  0x20   :  { %746 = vmatprep.mubr.msk.f32.mxu0 %vm971_vm0, %v972_v4 }
  0x21   :  { %932 = vmatpush3.bf16.msra.mxu1 %v931_v36  ;;  %953 = vmatpush3.bf16.msra.mxu0 %v952_v59 }
  0x22   :  { %933 = vmatprep.subr.bf16.mxu1 %v970_v0  ;;  %954 = vmatprep.subr.bf16.mxu0 %v970_v0 }
  0x23   :  { %747 = vmatmul.mubr.msk.f32.gmra.mrb[12].mxu0 %vm55_vm1, %v37_v39 }
  0x24   :  { %749 = vmatprep.mubr.msk.f32.mxu0 %vm971_vm0, %v972_v4 }
  0x25   :  { %935 = vmatpush3.bf16.msra.mxu1 %v934_v40  ;;  %956 = vmatpush3.bf16.msra.mxu0 %v955_v62 }
  0x26   :  { %936 = vmatprep.subr.bf16.mxu1 %v970_v0  ;;  %957 = vmatprep.subr.bf16.mxu0 %v970_v0 }
  0x27   :  { %750 = vmatmul.mubr.msk.f32.gmra.mrb[14].mxu0 %vm55_vm1, %v38_v41 }
  0x28   :  { %870 = vmatprep.mubr.msk.f32.mxu0 %vm971_vm0, %v972_v4 }
  0x29   :  { %938 = vmatpush3.bf16.msra.mxu1 %v937_v44  ;;  %959 = vmatpush3.bf16.msra.mxu0 %v958_v2 }
  0x2a   :  { %960 = vmatprep.subr.bf16.mxu0 %v970_v0 }
  0xde   :  { %v161_v5 = vpop.f32.mrb[0].mxu0  ;;  %v1232_v7 = vpop.f32.mrb[0].mxu1 }
  0xdf   :  { %v162_v8 = vadd.f32 %v1225_v3, %v161_v5  ;;  %v730_v9 = vpop.f32.mrb[1].mxu0  ;;  %v754_v10 = vpop.f32.mrb[1].mxu1  ;;  %v202_v52 = vadd.f32 %v1225_v3, %v1232_v7 }
  0xe0   :  { %v472_v10 = vld [vmem:[%s1406_s5 + $0x78] sm:$0xff] }
  0xe1   :  { %vm225_vm2 = vcmp.gt.f32.partialorder %v162_v8, 0.0  ;;  %v239_v0 = vmul.f32 %v1230_v6, %v162_v8  ;;  %v247_v55 = vmul.f32 %v1230_v6, %v202_v52  ;;  %vm233_vm10 = vcmp.gt.f32.partialorder %v202_v52, 0.0 }
  0xe2   :  { %v166_v11 = vpop.f32.mrb[2].mxu0  ;;  %v1236_v12 = vpop.f32.mrb[2].mxu1 }
  0xe3   :  { %v252_v13 = vsel %vm225_vm2, %v162_v8, %v239_v0  ;;  %v167_v14 = vadd.f32 %v1225_v3, %v166_v11  ;;  %v733_v15 = vpop.f32.mrb[3].mxu0  ;;  %v757_v16 = vpop.f32.mrb[3].mxu1  ;;  %v207_v56 = vadd.f32 %v1225_v3, %v1236_v12  ;;  %v260_v60 = vsel %vm233_vm10, %v202_v52, %v247_v55  ;;  %v1297_v11 = vld [vmem:[%s1409_s4] ss:$0 sm:$0xff] }
  0xe4   :  { %800 = vmatmul.mubr.f32.vlgmr.msra.gmra.mrb[10].mxu1 %v252_v13 }
  0xe5   :  { %v240_v17 = vmul.f32 %v1230_v6, %v167_v14  ;;  %802 = vmatprep.mubr.msk.f32.mxu1 %vm971_vm0, %v972_v4  ;;  %vm226_vm3 = vcmp.gt.f32.partialorder %v167_v14, 0.0  ;;  %v248_v58 = vmul.f32 %v1230_v6, %v207_v56  ;;  %vm234_vm11 = vcmp.gt.f32.partialorder %v207_v56, 0.0 }
  0xe6   :  { %v171_v18 = vpop.f32.mrb[4].mxu0  ;;  %v211_v19 = vpop.f32.mrb[4].mxu1 }
  0xe7   :  { %v172_v20 = vadd.f32 %v1225_v3, %v171_v18  ;;  %v736_v21 = vpop.f32.mrb[5].mxu0  ;;  %v253_v22 = vsel %vm226_vm3, %v167_v14, %v240_v17  ;;  %v760_v23 = vpop.f32.mrb[5].mxu1  ;;  %v212_v59 = vadd.f32 %v1225_v3, %v211_v19  ;;  %v261_v63 = vsel %vm234_vm11, %v207_v56, %v248_v58 }
  0xe8   :  { %803 = vmatmul.mubr.f32.gmra.mrb[12].mxu1 %v253_v22 }
  0xe9   :  { %v241_v24 = vmul.f32 %v1230_v6, %v172_v20  ;;  %805 = vmatprep.mubr.msk.f32.mxu1 %vm971_vm0, %v972_v4  ;;  %vm227_vm4 = vcmp.gt.f32.partialorder %v172_v20, 0.0  ;;  %v249_v61 = vmul.f32 %v1230_v6, %v212_v59  ;;  %vm235_vm12 = vcmp.gt.f32.partialorder %v212_v59, 0.0 }
  0xea   :  { %v176_v25 = vpop.f32.mrb[6].mxu0  ;;  %v216_v26 = vpop.f32.mrb[6].mxu1 }
  0xeb   :  { %v177_v27 = vadd.f32 %v1225_v3, %v176_v25  ;;  %v739_v28 = vpop.f32.mrb[7].mxu0  ;;  %v254_v29 = vsel %vm227_vm4, %v172_v20, %v241_v24  ;;  %v763_v30 = vpop.f32.mrb[7].mxu1  ;;  %v217_v62 = vadd.f32 %v1225_v3, %v216_v26  ;;  %v262_v5 = vsel %vm235_vm12, %v212_v59, %v249_v61 }
  0xec   :  { %806 = vmatmul.mubr.f32.gmra.mrb[14].mxu1 %v254_v29 }
  0xed   :  { %v242_v31 = vmul.f32 %v1230_v6, %v177_v27  ;;  %808 = vmatprep.mubr.msk.f32.mxu1 %vm971_vm0, %v972_v4  ;;  %vm228_vm5 = vcmp.gt.f32.partialorder %v177_v27, 0.0  ;;  %v250_v1 = vmul.f32 %v1230_v6, %v217_v62  ;;  %vm236_vm13 = vcmp.gt.f32.partialorder %v217_v62, 0.0 }
  0xee   :  { %v181_v32 = vpop.f32.mrb[8].mxu0  ;;  %v221_v33 = vpop.f32.mrb[8].mxu1 }
  0xef   :  { %v182_v34 = vadd.f32 %v1225_v3, %v181_v32  ;;  %v742_v35 = vpop.f32.mrb[9].mxu0  ;;  %v255_v36 = vsel %vm228_vm5, %v177_v27, %v242_v31  ;;  %v766_v37 = vpop.f32.mrb[9].mxu1  ;;  %v222_v2 = vadd.f32 %v1225_v3, %v221_v33  ;;  %v263_v8 = vsel %vm236_vm13, %v217_v62, %v250_v1 }
  0xf0   :  { %809 = vmatmul.mubr.f32.gmra.mrb[16].mxu1 %v255_v36  ;;  %vm610_vm13 = vcmask 130048  }
  0xf1   :  { %v243_v38 = vmul.f32 %v1230_v6, %v182_v34  ;;  %811 = vmatprep.mubr.msk.f32.mxu1 %vm971_vm0, %v972_v4  ;;  %vm229_vm6 = vcmp.gt.f32.partialorder %v182_v34, 0.0  ;;  %v251_v7 = vmul.f32 %v1230_v6, %v222_v2  ;;  %vm237_vm14 = vcmp.gt.f32.partialorder %v222_v2, 0.0 }
  0xf2   :  { %v186_v39 = vpop.f32.mrb[10].mxu0 }
  0xf3   :  { %v187_v40 = vadd.f32 %v1225_v3, %v186_v39  ;;  %v745_v41 = vpop.f32.mrb[11].mxu0  ;;  %v256_v42 = vsel %vm229_vm6, %v182_v34, %v243_v38  ;;  %v264_v9 = vsel %vm237_vm14, %v222_v2, %v251_v7 }
  0xf4   :  { %812 = vmatmul.mubr.f32.gmra.mrb[18].mxu1 %v256_v42 }
  0xf5   :  { %v244_v43 = vmul.f32 %v1230_v6, %v187_v40  ;;  %814 = vmatprep.mubr.msk.f32.mxu1 %vm971_vm0, %v972_v4  ;;  %vm230_vm7 = vcmp.gt.f32.partialorder %v187_v40, 0.0 }
  0xf6   :  { %v191_v44 = vpop.f32.mrb[12].mxu0 }
  0xf7   :  { %v192_v45 = vadd.f32 %v1225_v3, %v191_v44  ;;  %v748_v46 = vpop.f32.mrb[13].mxu0  ;;  %v257_v47 = vsel %vm230_vm7, %v187_v40, %v244_v43 }
  0xf8   :  { %815 = vmatmul.mubr.f32.gmra.mrb[20].mxu1 %v257_v47 }
  0xf9   :  { %v245_v48 = vmul.f32 %v1230_v6, %v192_v45  ;;  %817 = vmatprep.mubr.msk.f32.mxu1 %vm971_vm0, %v972_v4  ;;  %vm231_vm8 = vcmp.gt.f32.partialorder %v192_v45, 0.0 }
  0xfa   :  { %v196_v49 = vpop.f32.mrb[14].mxu0 }
  0xfb   :  { %v197_v50 = vadd.f32 %v1225_v3, %v196_v49  ;;  %v751_v51 = vpop.f32.mrb[15].mxu0  ;;  %v258_v53 = vsel %vm231_vm8, %v192_v45, %v245_v48  ;;  %v471_v3 = vld [vmem:[%s1406_s5 + $0x70] sm:$0xff] }
  0xfc   :  { %818 = vmatmul.mubr.f32.gmra.mrb[22].mxu1 %v258_v53  ;;  %v961_v0 = vpack.c.bf16 %v472_v10, %v471_v3 }
  0xfd   :  { %v246_v54 = vmul.f32 %v1230_v6, %v197_v50  ;;  %820 = vmatprep.mubr.msk.f32.mxu1 %vm971_vm0, %v972_v4  ;;  %vm232_vm9 = vcmp.gt.f32.partialorder %v197_v50, 0.0 }
  0xfe   :  { %962 = vmatpush3.bf16.msra.mxu0 %v961_v0 }
  0xff   :  { %v259_v57 = vsel %vm232_vm9, %v197_v50, %v246_v54 }
 0x100   :  { %821 = vmatmul.mubr.f32.gmra.mrb[24].mxu1 %v259_v57 }
 0x101   :  { %823 = vmatprep.mubr.msk.f32.mxu1 %vm971_vm0, %v972_v4 }
 0x104   :  { %824 = vmatmul.mubr.f32.gmra.mrb[26].mxu1 %v260_v60 }
 0x105   :  { %826 = vmatprep.mubr.msk.f32.mxu1 %vm971_vm0, %v972_v4 }
 0x108   :  { %827 = vmatmul.mubr.f32.gmra.mrb[28].mxu1 %v261_v63 }
 0x109   :  { %829 = vmatprep.mubr.msk.f32.mxu1 %vm971_vm0, %v972_v4 }
 0x10c   :  { %830 = vmatmul.mubr.f32.gmra.mrb[30].mxu1 %v262_v5 }
 0x10d   :  { %832 = vmatprep.mubr.msk.f32.mxu1 %vm971_vm0, %v972_v4 }
 0x110   :  { %833 = vmatmul.mubr.f32.gmra.mrb[32].mxu1 %v263_v8 }
 0x111   :  { %835 = vmatprep.mubr.msk.f32.mxu1 %vm971_vm0, %v972_v4 }
 0x114   :  { %836 = vmatmul.mubr.f32.gmra.mrb[34].mxu1 %v264_v9 }
 0x1b7   :  { %v354_v12 = vpop.f32.mrb[10].mxu1 }
 0x1b8   :  { %v355_v13 = vadd.f32 %v1297_v11, %v354_v12  ;;  %v801_v14 = vpop.f32.mrb[11].mxu1 }
 0x1ba   :  { %vm418_vm15 = vcmp.gt.f32.partialorder %v355_v13, 0.0  ;;  %v431_v15 = vmul.f32 %v355_v13, %v1230_v6 }
 0x1bb   :  { %v359_v16 = vpop.f32.mrb[12].mxu1 }
 0x1bc   :  { %v444_v17 = vsel %vm418_vm15, %v355_v13, %v431_v15  ;;  %v360_v18 = vadd.f32 %v1297_v11, %v359_v16  ;;  %v804_v19 = vpop.f32.mrb[13].mxu1  ;;  %v644_v16 = vld [vmem:[%s1410_s6] ss:$0 sm:$0xff] }
 0x1bd   :  { %871 = vmatmul.mubr.f32.vlgmr.msra.gmra.mrb[16].mxu0 %v444_v17 }
 0x1be   :  { %v432_v20 = vmul.f32 %v360_v18, %v1230_v6  ;;  %873 = vmatprep.mubr.msk.f32.mxu0 %vm971_vm0, %v972_v4  ;;  %vm419_vm1 = vcmp.gt.f32.partialorder %v360_v18, 0.0 }
 0x1bf   :  { %v364_v21 = vpop.f32.mrb[14].mxu1 }
 0x1c0   :  { %v365_v22 = vadd.f32 %v1297_v11, %v364_v21  ;;  %v807_v23 = vpop.f32.mrb[15].mxu1  ;;  %v445_v24 = vsel %vm419_vm1, %v360_v18, %v432_v20 }
 0x1c1   :  { %874 = vmatmul.mubr.f32.gmra.mrb[18].mxu0 %v445_v24 }
 0x1c2   :  { %v433_v25 = vmul.f32 %v365_v22, %v1230_v6  ;;  %876 = vmatprep.mubr.msk.f32.mxu0 %vm971_vm0, %v972_v4  ;;  %vm420_vm2 = vcmp.gt.f32.partialorder %v365_v22, 0.0 }
 0x1c3   :  { %v369_v26 = vpop.f32.mrb[16].mxu1 }
 0x1c4   :  { %v370_v27 = vadd.f32 %v1297_v11, %v369_v26  ;;  %v810_v28 = vpop.f32.mrb[17].mxu1  ;;  %v446_v29 = vsel %vm420_vm2, %v365_v22, %v433_v25 }
 0x1c5   :  { %877 = vmatmul.mubr.f32.gmra.mrb[20].mxu0 %v446_v29 }
 0x1c6   :  { %v434_v30 = vmul.f32 %v370_v27, %v1230_v6  ;;  %879 = vmatprep.mubr.msk.f32.mxu0 %vm971_vm0, %v972_v4  ;;  %vm421_vm3 = vcmp.gt.f32.partialorder %v370_v27, 0.0 }
 0x1c7   :  { %v374_v31 = vpop.f32.mrb[18].mxu1 }
 0x1c8   :  { %v375_v32 = vadd.f32 %v1297_v11, %v374_v31  ;;  %v813_v33 = vpop.f32.mrb[19].mxu1  ;;  %v447_v34 = vsel %vm421_vm3, %v370_v27, %v434_v30 }
 0x1c9   :  { %880 = vmatmul.mubr.f32.gmra.mrb[22].mxu0 %v447_v34 }
 0x1ca   :  { %v435_v35 = vmul.f32 %v375_v32, %v1230_v6  ;;  %882 = vmatprep.mubr.msk.f32.mxu0 %vm971_vm0, %v972_v4  ;;  %vm422_vm4 = vcmp.gt.f32.partialorder %v375_v32, 0.0 }
 0x1cb   :  { %v379_v36 = vpop.f32.mrb[20].mxu1 }
 0x1cc   :  { %v380_v37 = vadd.f32 %v1297_v11, %v379_v36  ;;  %v816_v38 = vpop.f32.mrb[21].mxu1  ;;  %v448_v39 = vsel %vm422_vm4, %v375_v32, %v435_v35 }
 0x1cd   :  { %883 = vmatmul.mubr.f32.gmra.mrb[24].mxu0 %v448_v39 }
 0x1ce   :  { %v436_v40 = vmul.f32 %v380_v37, %v1230_v6  ;;  %885 = vmatprep.mubr.msk.f32.mxu0 %vm971_vm0, %v972_v4  ;;  %vm423_vm5 = vcmp.gt.f32.partialorder %v380_v37, 0.0 }
 0x1cf   :  { %v384_v41 = vpop.f32.mrb[22].mxu1 }
 0x1d0   :  { %v385_v42 = vadd.f32 %v1297_v11, %v384_v41  ;;  %v819_v43 = vpop.f32.mrb[23].mxu1  ;;  %v449_v44 = vsel %vm423_vm5, %v380_v37, %v436_v40 }
 0x1d1   :  { %886 = vmatmul.mubr.f32.gmra.mrb[26].mxu0 %v449_v44 }
 0x1d2   :  { %v437_v45 = vmul.f32 %v385_v42, %v1230_v6  ;;  %888 = vmatprep.mubr.msk.f32.mxu0 %vm971_vm0, %v972_v4  ;;  %vm424_vm6 = vcmp.gt.f32.partialorder %v385_v42, 0.0 }
 0x1d3   :  { %v389_v46 = vpop.f32.mrb[24].mxu1 }
 0x1d4   :  { %v390_v47 = vadd.f32 %v1297_v11, %v389_v46  ;;  %v822_v48 = vpop.f32.mrb[25].mxu1  ;;  %v450_v49 = vsel %vm424_vm6, %v385_v42, %v437_v45 }
 0x1d5   :  { %889 = vmatmul.mubr.f32.gmra.mrb[28].mxu0 %v450_v49 }
 0x1d6   :  { %v438_v50 = vmul.f32 %v390_v47, %v1230_v6  ;;  %891 = vmatprep.mubr.msk.f32.mxu0 %vm971_vm0, %v972_v4  ;;  %vm425_vm7 = vcmp.gt.f32.partialorder %v390_v47, 0.0 }
 0x1d7   :  { %v394_v51 = vpop.f32.mrb[26].mxu1 }
 0x1d8   :  { %v395_v52 = vadd.f32 %v1297_v11, %v394_v51  ;;  %v825_v53 = vpop.f32.mrb[27].mxu1  ;;  %v451_v54 = vsel %vm425_vm7, %v390_v47, %v438_v50 }
 0x1d9   :  { %892 = vmatmul.mubr.f32.gmra.mrb[30].mxu0 %v451_v54 }
 0x1da   :  { %v439_v55 = vmul.f32 %v395_v52, %v1230_v6  ;;  %894 = vmatprep.mubr.msk.f32.mxu0 %vm971_vm0, %v972_v4  ;;  %vm426_vm8 = vcmp.gt.f32.partialorder %v395_v52, 0.0 }
 0x1db   :  { %v399_v56 = vpop.f32.mrb[28].mxu1 }
 0x1dc   :  { %v400_v57 = vadd.f32 %v1297_v11, %v399_v56  ;;  %v828_v58 = vpop.f32.mrb[29].mxu1  ;;  %v452_v59 = vsel %vm426_vm8, %v395_v52, %v439_v55 }
 0x1dd   :  { %895 = vmatmul.mubr.f32.gmra.mrb[32].mxu0 %v452_v59 }
 0x1de   :  { %v440_v60 = vmul.f32 %v400_v57, %v1230_v6  ;;  %897 = vmatprep.mubr.msk.f32.mxu0 %vm971_vm0, %v972_v4  ;;  %vm427_vm9 = vcmp.gt.f32.partialorder %v400_v57, 0.0 }
 0x1df   :  { %v404_v61 = vpop.f32.mrb[30].mxu1 }
 0x1e0   :  { %v405_v62 = vadd.f32 %v1297_v11, %v404_v61  ;;  %v831_v63 = vpop.f32.mrb[31].mxu1  ;;  %v453_v1 = vsel %vm427_vm9, %v400_v57, %v440_v60 }
 0x1e1   :  { %898 = vmatmul.mubr.f32.gmra.mrb[34].mxu0 %v453_v1 }
 0x1e2   :  { %v441_v2 = vmul.f32 %v405_v62, %v1230_v6  ;;  %900 = vmatprep.mubr.msk.f32.mxu0 %vm971_vm0, %v972_v4  ;;  %vm428_vm10 = vcmp.gt.f32.partialorder %v405_v62, 0.0 }
 0x1e3   :  { %v409_v5 = vpop.f32.mrb[32].mxu1 }
 0x1e4   :  { %v410_v7 = vadd.f32 %v1297_v11, %v409_v5  ;;  %v834_v8 = vpop.f32.mrb[33].mxu1  ;;  %v454_v9 = vsel %vm428_vm10, %v405_v62, %v441_v2 }
 0x1e5   :  { %901 = vmatmul.mubr.f32.gmra.mrb[36].mxu0 %v454_v9 }
 0x1e6   :  { %v442_v3 = vmul.f32 %v410_v7, %v1230_v6  ;;  %903 = vmatprep.mubr.msk.f32.mxu0 %vm971_vm0, %v972_v4  ;;  %vm429_vm11 = vcmp.gt.f32.partialorder %v410_v7, 0.0 }
 0x1e7   :  { %v414_v10 = vpop.f32.mrb[34].mxu1 }
 0x1e8   :  { %v415_v0 = vadd.f32 %v1297_v11, %v414_v10  ;;  %v837_v12 = vpop.f32.mrb[35].mxu1  ;;  %v455_v13 = vsel %vm429_vm11, %v410_v7, %v442_v3 }
 0x1e9   :  { %904 = vmatmul.mubr.f32.gmra.mrb[38].mxu0 %v455_v13 }
 0x1ea   :  { %v443_v14 = vmul.f32 %v415_v0, %v1230_v6  ;;  %906 = vmatprep.mubr.msk.f32.mxu0 %vm971_vm0, %v972_v4  ;;  %vm430_vm12 = vcmp.gt.f32.partialorder %v415_v0, 0.0  ;;  %vm623_vm0 = vcmask 125952  }
 0x1ec   :  { %v456_v15 = vsel %vm430_vm12, %v415_v0, %v443_v14 }
 0x1ed   :  { %907 = vmatmul.mubr.f32.gmra.mrb[40].mxu0 %v456_v15 }
 0x290   :  { %v546_v17 = vpop.f32.mrb[16].mxu0 }
 0x291   :  { %v547_v18 = vadd.f32 %v644_v16, %v546_v17  ;;  %v872_v19 = vpop.f32.mrb[17].mxu0 }
 0x293   :  { %611 = vst.msk [vmem:[%s1411_s8] sm:$0xff] %vm610_vm13, %v547_v18 }
 0x294   :  { %v551_v6 = vpop.f32.mrb[18].mxu0 }
 0x295   :  { %v552_v11 = vadd.f32 %v644_v16, %v551_v6  ;;  %v875_v20 = vpop.f32.mrb[19].mxu0 }
 0x297   :  { %612 = vst.msk [vmem:[%s1411_s8 + $0x8] sm:$0xff] %vm610_vm13, %v552_v11 }
 0x298   :  { %v556_v4 = vpop.f32.mrb[20].mxu0 }
 0x299   :  { %v557_v21 = vadd.f32 %v644_v16, %v556_v4  ;;  %v878_v22 = vpop.f32.mrb[21].mxu0 }
 0x29b   :  { %613 = vst.msk [vmem:[%s1411_s8 + $0x10] sm:$0xff] %vm610_vm13, %v557_v21 }
 0x29c   :  { %v561_v23 = vpop.f32.mrb[22].mxu0 }
 0x29d   :  { %v562_v24 = vadd.f32 %v644_v16, %v561_v23  ;;  %v881_v25 = vpop.f32.mrb[23].mxu0 }
 0x29f   :  { %614 = vst.msk [vmem:[%s1411_s8 + $0x18] sm:$0xff] %vm610_vm13, %v562_v24 }
 0x2a0   :  { %v566_v26 = vpop.f32.mrb[24].mxu0 }
 0x2a1   :  { %v567_v27 = vadd.f32 %v644_v16, %v566_v26  ;;  %v884_v28 = vpop.f32.mrb[25].mxu0 }
 0x2a3   :  { %615 = vst.msk [vmem:[%s1411_s8 + $0x20] sm:$0xff] %vm610_vm13, %v567_v27 }
 0x2a4   :  { %v571_v29 = vpop.f32.mrb[26].mxu0 }
 0x2a5   :  { %v572_v30 = vadd.f32 %v644_v16, %v571_v29  ;;  %v887_v31 = vpop.f32.mrb[27].mxu0 }
 0x2a7   :  { %616 = vst.msk [vmem:[%s1411_s8 + $0x28] sm:$0xff] %vm610_vm13, %v572_v30 }
 0x2a8   :  { %v576_v32 = vpop.f32.mrb[28].mxu0 }
 0x2a9   :  { %v577_v33 = vadd.f32 %v644_v16, %v576_v32  ;;  %v890_v34 = vpop.f32.mrb[29].mxu0 }
 0x2ab   :  { %617 = vst.msk [vmem:[%s1411_s8 + $0x30] sm:$0xff] %vm610_vm13, %v577_v33 }
 0x2ac   :  { %v581_v35 = vpop.f32.mrb[30].mxu0 }
 0x2ad   :  { %v582_v36 = vadd.f32 %v644_v16, %v581_v35  ;;  %v893_v37 = vpop.f32.mrb[31].mxu0 }
 0x2af   :  { %618 = vst.msk [vmem:[%s1411_s8 + $0x38] sm:$0xff] %vm610_vm13, %v582_v36 }
 0x2b0   :  { %v586_v38 = vpop.f32.mrb[32].mxu0 }
 0x2b1   :  { %v587_v39 = vadd.f32 %v644_v16, %v586_v38  ;;  %v896_v40 = vpop.f32.mrb[33].mxu0 }
 0x2b3   :  { %619 = vst.msk [vmem:[%s1411_s8 + $0x40] sm:$0xff] %vm610_vm13, %v587_v39 }
 0x2b4   :  { %v591_v41 = vpop.f32.mrb[34].mxu0 }
 0x2b5   :  { %v592_v42 = vadd.f32 %v644_v16, %v591_v41  ;;  %v899_v43 = vpop.f32.mrb[35].mxu0 }
 0x2b7   :  { %620 = vst.msk [vmem:[%s1411_s8 + $0x48] sm:$0xff] %vm610_vm13, %v592_v42 }
 0x2b8   :  { %v596_v44 = vpop.f32.mrb[36].mxu0 }
 0x2b9   :  { %v597_v45 = vadd.f32 %v644_v16, %v596_v44  ;;  %v902_v46 = vpop.f32.mrb[37].mxu0 }
 0x2bb   :  { %621 = vst.msk [vmem:[%s1411_s8 + $0x50] sm:$0xff] %vm610_vm13, %v597_v45 }
 0x2bc   :  { %v601_v47 = vpop.f32.mrb[38].mxu0 }
 0x2bd   :  { %v602_v48 = vadd.f32 %v644_v16, %v601_v47  ;;  %v905_v49 = vpop.f32.mrb[39].mxu0 }
 0x2bf   :  { %622 = vst.msk [vmem:[%s1411_s8 + $0x58] sm:$0xff] %vm610_vm13, %v602_v48 }
 0x2c0   :  { %v606_v50 = vpop.f32.mrb[40].mxu0 }
 0x2c1   :  { %v607_v51 = vadd.f32 %v644_v16, %v606_v50  ;;  %v908_v52 = vpop.f32.mrb[41].mxu0 }
 0x2c3   :  { %624 = vst.msk [vmem:[%s1411_s8 + $0x60] sm:$0xf] %vm623_vm0, %v607_v51 }

// kernel: tpu_custom_call.1
= control target key start
LH: loop header
LB: loop body
LE: loop exit
PB: predicated region body
PF: predicated region fallthrough
CT: control target
= control target key end

     0   :  { %v970_v0 = vmov 0.0|0.0   ;;  %vm971_vm0 = vmmov 0   ;;  %v972_v4 = vmov 0.0   ;;  %vm55_vm1 = vcmask 261120   ;;  %s1403_s1 = inlined_call_operand.vmem [shape: f32[32,128], index: 1, kind: input, shape index: {}]   ;;  %s1404_s3 = inlined_call_operand.vmem [shape: f32[128,128], index: 3, kind: input, shape index: {}]   ;;  %s1405_s0 = inlined_call_operand.vmem [shape: f32[100,32], index: 0, kind: input, shape index: {}]   ;;  %s1406_s5 = inlined_call_operand.vmem [shape: f32[128,16], index: 5, kind: input, shape index: {}]   ;;  %s1407_s2 = inlined_call_operand.vmem [shape: f32[1,128], index: 2, kind: input, shape index: {}]   ;;  %s1408_s7 = inlined_call_operand.<no memory space> [shape: f32[1], index: 7, kind: input, shape index: {}]   ;;  %s1409_s4 = inlined_call_operand.vmem [shape: f32[1,128], index: 4, kind: input, shape index: {}]   ;;  %s1410_s6 = inlined_call_operand.vmem [shape: f32[1,16], index: 6, kind: input, shape index: {}]   ;;  %s1411_s8 = inlined_call_operand.vmem [shape: f32[100,16], index: 8, kind: output, shape index: {}]  }
   0x1   :  { %909 = vmatprep.subr.bf16.mxu0 %v970_v0  ;;  %v44_v1 = vld [vmem:[%s1403_s1] sm:$0xff]  ;;  %v45_v2 = vld [vmem:[%s1403_s1 + $0x8] sm:$0xff]  ;;  %v46_v3 = vld [vmem:[%s1403_s1 + $0x10] sm:$0xff]  ;;  %728 = vmatprep.mubr.msk.f32.mxu0 %vm971_vm0, %v972_v4 }
   0x2   :  { %v910_v5 = vpack.c.bf16 %v45_v2, %v44_v1  ;;  %v47_v6 = vld [vmem:[%s1403_s1 + $0x18] sm:$0xff]  ;;  %963 = vmatprep.subr.bf16.mxu1 %v970_v0  ;;  %752 = vmatprep.mubr.msk.f32.mxu1 %vm971_vm0, %v972_v4  ;;  %v265_v8 = vld [vmem:[%s1404_s3] sm:$0xff]  ;;  %v266_v9 = vld [vmem:[%s1404_s3 + $0x8] sm:$0xff] }
   0x3   :  { %v913_v7 = vpack.c.bf16 %v47_v6, %v46_v3  ;;  %v31_v10 = vld [vmem:[%s1405_s0] sm:$0xff]  ;;  %v916_v12 = vpack.c.bf16 %v266_v9, %v265_v8  ;;  %v267_v13 = vld [vmem:[%s1404_s3 + $0x10] sm:$0xff]  ;;  %v268_v14 = vld [vmem:[%s1404_s3 + $0x18] sm:$0xff]  ;;  %v1230_v6 = vstv %s1408_s7 }
   0x4   :  { %911 = vmatpush3.bf16.msra.mxu0 %v910_v5  ;;  %965 = vmatpush3.bf16.msra.mxu1 %v910_v5  ;;  %v39_v11 = vld [vmem:[%s1405_s0 + $0x40] sm:$0xff]  ;;  %v32_v15 = vld [vmem:[%s1405_s0 + $0x8] sm:$0xff]  ;;  %v919_v17 = vpack.c.bf16 %v268_v14, %v267_v13  ;;  %v33_v20 = vld [vmem:[%s1405_s0 + $0x10] sm:$0xff] }
   0x5   :  { %912 = vmatprep.subr.bf16.mxu0 %v970_v0  ;;  %964 = vmatprep.subr.bf16.mxu1 %v970_v0  ;;  %v40_v16 = vld [vmem:[%s1405_s0 + $0x48] sm:$0xff]  ;;  %v269_v18 = vld [vmem:[%s1404_s3 + $0x20] sm:$0xff]  ;;  %v41_v21 = vld [vmem:[%s1405_s0 + $0x50] sm:$0xff] }
   0x6   :  { %v270_v19 = vld [vmem:[%s1404_s3 + $0x28] sm:$0xff]  ;;  %v271_v23 = vld [vmem:[%s1404_s3 + $0x30] sm:$0xff]  ;;  %v272_v24 = vld [vmem:[%s1404_s3 + $0x38] sm:$0xff] }
   0x7   :  { %v922_v22 = vpack.c.bf16 %v270_v19, %v269_v18  ;;  %v34_v25 = vld [vmem:[%s1405_s0 + $0x18] sm:$0xff]  ;;  %v925_v27 = vpack.c.bf16 %v272_v24, %v271_v23  ;;  %v273_v28 = vld [vmem:[%s1404_s3 + $0x40] sm:$0xff]  ;;  %v274_v29 = vld [vmem:[%s1404_s3 + $0x48] sm:$0xff] }
   0x8   :  { %914 = vmatpush3.bf16.msra.mxu0 %v913_v7  ;;  %966 = vmatpush3.bf16.msra.mxu1 %v913_v7  ;;  %v42_v26 = vld [vmem:[%s1405_s0 + $0x58] sm:$0xff]  ;;  %v35_v30 = vld [vmem:[%s1405_s0 + $0x20] sm:$0xff]  ;;  %v928_v32 = vpack.c.bf16 %v274_v29, %v273_v28  ;;  %v275_v33 = vld [vmem:[%s1404_s3 + $0x50] sm:$0xff] }
   0x9   :  { %915 = vmatprep.subr.bf16.mxu1 %v970_v0  ;;  %939 = vmatprep.subr.bf16.mxu0 %v970_v0  ;;  %v43_v31 = vld [vmem:[%s1405_s0 + $0x60] sm:$0xf]  ;;  %v276_v34 = vld [vmem:[%s1404_s3 + $0x58] sm:$0xff]  ;;  %v36_v35 = vld [vmem:[%s1405_s0 + $0x28] sm:$0xff] }
   0xa   :  { %v931_v36 = vpack.c.bf16 %v276_v34, %v275_v33  ;;  %v277_v37 = vld [vmem:[%s1404_s3 + $0x60] sm:$0xff]  ;;  %v278_v38 = vld [vmem:[%s1404_s3 + $0x68] sm:$0xff]  ;;  %v37_v39 = vld [vmem:[%s1405_s0 + $0x30] sm:$0xff] }
   0xb   :  { %729 = vmatmul.mubr.msk.f32.vlgmr.msra.gmra.mrb[0].mxu0 %vm55_vm1, %v31_v10  ;;  %753 = vmatmul.mubr.msk.f32.vlgmr.msra.gmra.mrb[0].mxu1 %vm55_vm1, %v39_v11  ;;  %v934_v40 = vpack.c.bf16 %v278_v38, %v277_v37  ;;  %v38_v41 = vld [vmem:[%s1405_s0 + $0x38] sm:$0xff]  ;;  %v279_v42 = vld [vmem:[%s1404_s3 + $0x70] sm:$0xff]  ;;  %v457_v45 = vld [vmem:[%s1406_s5] sm:$0xff] }
   0xc   :  { %731 = vmatprep.mubr.msk.f32.mxu0 %vm971_vm0, %v972_v4  ;;  %755 = vmatprep.mubr.msk.f32.mxu1 %vm971_vm0, %v972_v4  ;;  %v280_v43 = vld [vmem:[%s1404_s3 + $0x78] sm:$0xff]  ;;  %v458_v46 = vld [vmem:[%s1406_s5 + $0x8] sm:$0xff]  ;;  %v459_v47 = vld [vmem:[%s1406_s5 + $0x10] sm:$0xff] }
   0xd   :  { %917 = vmatpush3.bf16.msra.mxu1 %v916_v12  ;;  %v937_v44 = vpack.c.bf16 %v280_v43, %v279_v42  ;;  %v940_v48 = vpack.c.bf16 %v458_v46, %v457_v45  ;;  %v460_v49 = vld [vmem:[%s1406_s5 + $0x18] sm:$0xff]  ;;  %v461_v51 = vld [vmem:[%s1406_s5 + $0x20] sm:$0xff]  ;;  %v462_v52 = vld [vmem:[%s1406_s5 + $0x28] sm:$0xff] }
   0xe   :  { %918 = vmatprep.subr.bf16.mxu1 %v970_v0  ;;  %v943_v50 = vpack.c.bf16 %v460_v49, %v459_v47  ;;  %v946_v53 = vpack.c.bf16 %v462_v52, %v461_v51  ;;  %v463_v54 = vld [vmem:[%s1406_s5 + $0x30] sm:$0xff]  ;;  %v464_v55 = vld [vmem:[%s1406_s5 + $0x38] sm:$0xff]  ;;  %v465_v57 = vld [vmem:[%s1406_s5 + $0x40] sm:$0xff] }
   0xf   :  { %732 = vmatmul.mubr.msk.f32.gmra.mrb[2].mxu0 %vm55_vm1, %v32_v15  ;;  %756 = vmatmul.mubr.msk.f32.gmra.mrb[2].mxu1 %vm55_vm1, %v40_v16  ;;  %v949_v56 = vpack.c.bf16 %v464_v55, %v463_v54  ;;  %v466_v58 = vld [vmem:[%s1406_s5 + $0x48] sm:$0xff]  ;;  %v467_v60 = vld [vmem:[%s1406_s5 + $0x50] sm:$0xff]  ;;  %v468_v61 = vld [vmem:[%s1406_s5 + $0x58] sm:$0xff] }
  0x10   :  { %734 = vmatprep.mubr.msk.f32.mxu0 %vm971_vm0, %v972_v4  ;;  %758 = vmatprep.mubr.msk.f32.mxu1 %vm971_vm0, %v972_v4  ;;  %v952_v59 = vpack.c.bf16 %v466_v58, %v465_v57  ;;  %v955_v62 = vpack.c.bf16 %v468_v61, %v467_v60  ;;  %v469_v63 = vld [vmem:[%s1406_s5 + $0x60] sm:$0xff]  ;;  %v470_v1 = vld [vmem:[%s1406_s5 + $0x68] sm:$0xff] }
  0x11   :  { %920 = vmatpush3.bf16.msra.mxu1 %v919_v17  ;;  %941 = vmatpush3.bf16.msra.mxu0 %v940_v48  ;;  %v958_v2 = vpack.c.bf16 %v470_v1, %v469_v63  ;;  %v1225_v3 = vld [vmem:[%s1407_s2] ss:$0 sm:$0xff] }
  0x12   :  { %921 = vmatprep.subr.bf16.mxu1 %v970_v0  ;;  %942 = vmatprep.subr.bf16.mxu0 %v970_v0 }
  0x13   :  { %735 = vmatmul.mubr.msk.f32.gmra.mrb[4].mxu0 %vm55_vm1, %v33_v20  ;;  %759 = vmatmul.mubr.msk.f32.gmra.mrb[4].mxu1 %vm55_vm1, %v41_v21 }
  0x14   :  { %737 = vmatprep.mubr.msk.f32.mxu0 %vm971_vm0, %v972_v4  ;;  %761 = vmatprep.mubr.msk.f32.mxu1 %vm971_vm0, %v972_v4 }
  0x15   :  { %923 = vmatpush3.bf16.msra.mxu1 %v922_v22  ;;  %944 = vmatpush3.bf16.msra.mxu0 %v943_v50 }
  0x16   :  { %924 = vmatprep.subr.bf16.mxu1 %v970_v0  ;;  %945 = vmatprep.subr.bf16.mxu0 %v970_v0 }
  0x17   :  { %738 = vmatmul.mubr.msk.f32.gmra.mrb[6].mxu0 %vm55_vm1, %v34_v25  ;;  %762 = vmatmul.mubr.msk.f32.gmra.mrb[6].mxu1 %vm55_vm1, %v42_v26 }
  0x18   :  { %740 = vmatprep.mubr.msk.f32.mxu0 %vm971_vm0, %v972_v4  ;;  %764 = vmatprep.mubr.msk.f32.mxu1 %vm971_vm0, %v972_v4 }
  0x19   :  { %926 = vmatpush3.bf16.msra.mxu1 %v925_v27  ;;  %947 = vmatpush3.bf16.msra.mxu0 %v946_v53 }
  0x1a   :  { %927 = vmatprep.subr.bf16.mxu1 %v970_v0  ;;  %948 = vmatprep.subr.bf16.mxu0 %v970_v0 }
  0x1b   :  { %741 = vmatmul.mubr.msk.f32.gmra.mrb[8].mxu0 %vm55_vm1, %v35_v30  ;;  %765 = vmatmul.mubr.msk.f32.gmra.mrb[8].mxu1 %vm55_vm1, %v43_v31 }
  0x1c   :  { %743 = vmatprep.mubr.msk.f32.mxu0 %vm971_vm0, %v972_v4  ;;  %799 = vmatprep.mubr.msk.f32.mxu1 %vm971_vm0, %v972_v4 }
  0x1d   :  { %929 = vmatpush3.bf16.msra.mxu1 %v928_v32  ;;  %950 = vmatpush3.bf16.msra.mxu0 %v949_v56 }
  0x1e   :  { %930 = vmatprep.subr.bf16.mxu1 %v970_v0  ;;  %951 = vmatprep.subr.bf16.mxu0 %v970_v0 }
  0x1f   :  { %744 = vmatmul.mubr.msk.f32.gmra.mrb[10].mxu0 %vm55_vm1, %v36_v35 }
  0x20   :  { %746 = vmatprep.mubr.msk.f32.mxu0 %vm971_vm0, %v972_v4 }
  0x21   :  { %932 = vmatpush3.bf16.msra.mxu1 %v931_v36  ;;  %953 = vmatpush3.bf16.msra.mxu0 %v952_v59 }
  0x22   :  { %933 = vmatprep.subr.bf16.mxu1 %v970_v0  ;;  %954 = vmatprep.subr.bf16.mxu0 %v970_v0 }
  0x23   :  { %747 = vmatmul.mubr.msk.f32.gmra.mrb[12].mxu0 %vm55_vm1, %v37_v39 }
  0x24   :  { %749 = vmatprep.mubr.msk.f32.mxu0 %vm971_vm0, %v972_v4 }
  0x25   :  { %935 = vmatpush3.bf16.msra.mxu1 %v934_v40  ;;  %956 = vmatpush3.bf16.msra.mxu0 %v955_v62 }
  0x26   :  { %936 = vmatprep.subr.bf16.mxu1 %v970_v0  ;;  %957 = vmatprep.subr.bf16.mxu0 %v970_v0 }
  0x27   :  { %750 = vmatmul.mubr.msk.f32.gmra.mrb[14].mxu0 %vm55_vm1, %v38_v41 }
  0x28   :  { %870 = vmatprep.mubr.msk.f32.mxu0 %vm971_vm0, %v972_v4 }
  0x29   :  { %938 = vmatpush3.bf16.msra.mxu1 %v937_v44  ;;  %959 = vmatpush3.bf16.msra.mxu0 %v958_v2 }
  0x2a   :  { %960 = vmatprep.subr.bf16.mxu0 %v970_v0 }
  0xde   :  { %v161_v5 = vpop.f32.mrb[0].mxu0  ;;  %v1232_v7 = vpop.f32.mrb[0].mxu1 }
  0xdf   :  { %v162_v8 = vadd.f32 %v1225_v3, %v161_v5  ;;  %v730_v9 = vpop.f32.mrb[1].mxu0  ;;  %v754_v10 = vpop.f32.mrb[1].mxu1  ;;  %v202_v52 = vadd.f32 %v1225_v3, %v1232_v7 }
  0xe0   :  { %v472_v10 = vld [vmem:[%s1406_s5 + $0x78] sm:$0xff] }
  0xe1   :  { %vm225_vm2 = vcmp.gt.f32.partialorder %v162_v8, 0.0  ;;  %v239_v0 = vmul.f32 %v1230_v6, %v162_v8  ;;  %v247_v55 = vmul.f32 %v1230_v6, %v202_v52  ;;  %vm233_vm10 = vcmp.gt.f32.partialorder %v202_v52, 0.0 }
  0xe2   :  { %v166_v11 = vpop.f32.mrb[2].mxu0  ;;  %v1236_v12 = vpop.f32.mrb[2].mxu1 }
  0xe3   :  { %v252_v13 = vsel %vm225_vm2, %v162_v8, %v239_v0  ;;  %v167_v14 = vadd.f32 %v1225_v3, %v166_v11  ;;  %v733_v15 = vpop.f32.mrb[3].mxu0  ;;  %v757_v16 = vpop.f32.mrb[3].mxu1  ;;  %v207_v56 = vadd.f32 %v1225_v3, %v1236_v12  ;;  %v260_v60 = vsel %vm233_vm10, %v202_v52, %v247_v55  ;;  %v1297_v11 = vld [vmem:[%s1409_s4] ss:$0 sm:$0xff] }
  0xe4   :  { %800 = vmatmul.mubr.f32.vlgmr.msra.gmra.mrb[10].mxu1 %v252_v13 }
  0xe5   :  { %v240_v17 = vmul.f32 %v1230_v6, %v167_v14  ;;  %802 = vmatprep.mubr.msk.f32.mxu1 %vm971_vm0, %v972_v4  ;;  %vm226_vm3 = vcmp.gt.f32.partialorder %v167_v14, 0.0  ;;  %v248_v58 = vmul.f32 %v1230_v6, %v207_v56  ;;  %vm234_vm11 = vcmp.gt.f32.partialorder %v207_v56, 0.0 }
  0xe6   :  { %v171_v18 = vpop.f32.mrb[4].mxu0  ;;  %v211_v19 = vpop.f32.mrb[4].mxu1 }
  0xe7   :  { %v172_v20 = vadd.f32 %v1225_v3, %v171_v18  ;;  %v736_v21 = vpop.f32.mrb[5].mxu0  ;;  %v253_v22 = vsel %vm226_vm3, %v167_v14, %v240_v17  ;;  %v760_v23 = vpop.f32.mrb[5].mxu1  ;;  %v212_v59 = vadd.f32 %v1225_v3, %v211_v19  ;;  %v261_v63 = vsel %vm234_vm11, %v207_v56, %v248_v58 }
  0xe8   :  { %803 = vmatmul.mubr.f32.gmra.mrb[12].mxu1 %v253_v22 }
  0xe9   :  { %v241_v24 = vmul.f32 %v1230_v6, %v172_v20  ;;  %805 = vmatprep.mubr.msk.f32.mxu1 %vm971_vm0, %v972_v4  ;;  %vm227_vm4 = vcmp.gt.f32.partialorder %v172_v20, 0.0  ;;  %v249_v61 = vmul.f32 %v1230_v6, %v212_v59  ;;  %vm235_vm12 = vcmp.gt.f32.partialorder %v212_v59, 0.0 }
  0xea   :  { %v176_v25 = vpop.f32.mrb[6].mxu0  ;;  %v216_v26 = vpop.f32.mrb[6].mxu1 }
  0xeb   :  { %v177_v27 = vadd.f32 %v1225_v3, %v176_v25  ;;  %v739_v28 = vpop.f32.mrb[7].mxu0  ;;  %v254_v29 = vsel %vm227_vm4, %v172_v20, %v241_v24  ;;  %v763_v30 = vpop.f32.mrb[7].mxu1  ;;  %v217_v62 = vadd.f32 %v1225_v3, %v216_v26  ;;  %v262_v5 = vsel %vm235_vm12, %v212_v59, %v249_v61 }
  0xec   :  { %806 = vmatmul.mubr.f32.gmra.mrb[14].mxu1 %v254_v29 }
  0xed   :  { %v242_v31 = vmul.f32 %v1230_v6, %v177_v27  ;;  %808 = vmatprep.mubr.msk.f32.mxu1 %vm971_vm0, %v972_v4  ;;  %vm228_vm5 = vcmp.gt.f32.partialorder %v177_v27, 0.0  ;;  %v250_v1 = vmul.f32 %v1230_v6, %v217_v62  ;;  %vm236_vm13 = vcmp.gt.f32.partialorder %v217_v62, 0.0 }
  0xee   :  { %v181_v32 = vpop.f32.mrb[8].mxu0  ;;  %v221_v33 = vpop.f32.mrb[8].mxu1 }
  0xef   :  { %v182_v34 = vadd.f32 %v1225_v3, %v181_v32  ;;  %v742_v35 = vpop.f32.mrb[9].mxu0  ;;  %v255_v36 = vsel %vm228_vm5, %v177_v27, %v242_v31  ;;  %v766_v37 = vpop.f32.mrb[9].mxu1  ;;  %v222_v2 = vadd.f32 %v1225_v3, %v221_v33  ;;  %v263_v8 = vsel %vm236_vm13, %v217_v62, %v250_v1 }
  0xf0   :  { %809 = vmatmul.mubr.f32.gmra.mrb[16].mxu1 %v255_v36  ;;  %vm610_vm13 = vcmask 130048  }
  0xf1   :  { %v243_v38 = vmul.f32 %v1230_v6, %v182_v34  ;;  %811 = vmatprep.mubr.msk.f32.mxu1 %vm971_vm0, %v972_v4  ;;  %vm229_vm6 = vcmp.gt.f32.partialorder %v182_v34, 0.0  ;;  %v251_v7 = vmul.f32 %v1230_v6, %v222_v2  ;;  %vm237_vm14 = vcmp.gt.f32.partialorder %v222_v2, 0.0 }
  0xf2   :  { %v186_v39 = vpop.f32.mrb[10].mxu0 }
  0xf3   :  { %v187_v40 = vadd.f32 %v1225_v3, %v186_v39  ;;  %v745_v41 = vpop.f32.mrb[11].mxu0  ;;  %v256_v42 = vsel %vm229_vm6, %v182_v34, %v243_v38  ;;  %v264_v9 = vsel %vm237_vm14, %v222_v2, %v251_v7 }
  0xf4   :  { %812 = vmatmul.mubr.f32.gmra.mrb[18].mxu1 %v256_v42 }
  0xf5   :  { %v244_v43 = vmul.f32 %v1230_v6, %v187_v40  ;;  %814 = vmatprep.mubr.msk.f32.mxu1 %vm971_vm0, %v972_v4  ;;  %vm230_vm7 = vcmp.gt.f32.partialorder %v187_v40, 0.0 }
  0xf6   :  { %v191_v44 = vpop.f32.mrb[12].mxu0 }
  0xf7   :  { %v192_v45 = vadd.f32 %v1225_v3, %v191_v44  ;;  %v748_v46 = vpop.f32.mrb[13].mxu0  ;;  %v257_v47 = vsel %vm230_vm7, %v187_v40, %v244_v43 }
  0xf8   :  { %815 = vmatmul.mubr.f32.gmra.mrb[20].mxu1 %v257_v47 }
  0xf9   :  { %v245_v48 = vmul.f32 %v1230_v6, %v192_v45  ;;  %817 = vmatprep.mubr.msk.f32.mxu1 %vm971_vm0, %v972_v4  ;;  %vm231_vm8 = vcmp.gt.f32.partialorder %v192_v45, 0.0 }
  0xfa   :  { %v196_v49 = vpop.f32.mrb[14].mxu0 }
  0xfb   :  { %v197_v50 = vadd.f32 %v1225_v3, %v196_v49  ;;  %v751_v51 = vpop.f32.mrb[15].mxu0  ;;  %v258_v53 = vsel %vm231_vm8, %v192_v45, %v245_v48  ;;  %v471_v3 = vld [vmem:[%s1406_s5 + $0x70] sm:$0xff] }
  0xfc   :  { %818 = vmatmul.mubr.f32.gmra.mrb[22].mxu1 %v258_v53  ;;  %v961_v0 = vpack.c.bf16 %v472_v10, %v471_v3 }
  0xfd   :  { %v246_v54 = vmul.f32 %v1230_v6, %v197_v50  ;;  %820 = vmatprep.mubr.msk.f32.mxu1 %vm971_vm0, %v972_v4  ;;  %vm232_vm9 = vcmp.gt.f32.partialorder %v197_v50, 0.0 }
  0xfe   :  { %962 = vmatpush3.bf16.msra.mxu0 %v961_v0 }
  0xff   :  { %v259_v57 = vsel %vm232_vm9, %v197_v50, %v246_v54 }
 0x100   :  { %821 = vmatmul.mubr.f32.gmra.mrb[24].mxu1 %v259_v57 }
 0x101   :  { %823 = vmatprep.mubr.msk.f32.mxu1 %vm971_vm0, %v972_v4 }
 0x104   :  { %824 = vmatmul.mubr.f32.gmra.mrb[26].mxu1 %v260_v60 }
 0x105   :  { %826 = vmatprep.mubr.msk.f32.mxu1 %vm971_vm0, %v972_v4 }
 0x108   :  { %827 = vmatmul.mubr.f32.gmra.mrb[28].mxu1 %v261_v63 }
 0x109   :  { %829 = vmatprep.mubr.msk.f32.mxu1 %vm971_vm0, %v972_v4 }
 0x10c   :  { %830 = vmatmul.mubr.f32.gmra.mrb[30].mxu1 %v262_v5 }
 0x10d   :  { %832 = vmatprep.mubr.msk.f32.mxu1 %vm971_vm0, %v972_v4 }
 0x110   :  { %833 = vmatmul.mubr.f32.gmra.mrb[32].mxu1 %v263_v8 }
 0x111   :  { %835 = vmatprep.mubr.msk.f32.mxu1 %vm971_vm0, %v972_v4 }
 0x114   :  { %836 = vmatmul.mubr.f32.gmra.mrb[34].mxu1 %v264_v9 }
 0x1b7   :  { %v354_v12 = vpop.f32.mrb[10].mxu1 }
 0x1b8   :  { %v355_v13 = vadd.f32 %v1297_v11, %v354_v12  ;;  %v801_v14 = vpop.f32.mrb[11].mxu1 }
 0x1ba   :  { %vm418_vm15 = vcmp.gt.f32.partialorder %v355_v13, 0.0  ;;  %v431_v15 = vmul.f32 %v355_v13, %v1230_v6 }
 0x1bb   :  { %v359_v16 = vpop.f32.mrb[12].mxu1 }
 0x1bc   :  { %v444_v17 = vsel %vm418_vm15, %v355_v13, %v431_v15  ;;  %v360_v18 = vadd.f32 %v1297_v11, %v359_v16  ;;  %v804_v19 = vpop.f32.mrb[13].mxu1  ;;  %v644_v16 = vld [vmem:[%s1410_s6] ss:$0 sm:$0xff] }
 0x1bd   :  { %871 = vmatmul.mubr.f32.vlgmr.msra.gmra.mrb[16].mxu0 %v444_v17 }
 0x1be   :  { %v432_v20 = vmul.f32 %v360_v18, %v1230_v6  ;;  %873 = vmatprep.mubr.msk.f32.mxu0 %vm971_vm0, %v972_v4  ;;  %vm419_vm1 = vcmp.gt.f32.partialorder %v360_v18, 0.0 }
 0x1bf   :  { %v364_v21 = vpop.f32.mrb[14].mxu1 }
 0x1c0   :  { %v365_v22 = vadd.f32 %v1297_v11, %v364_v21  ;;  %v807_v23 = vpop.f32.mrb[15].mxu1  ;;  %v445_v24 = vsel %vm419_vm1, %v360_v18, %v432_v20 }
 0x1c1   :  { %874 = vmatmul.mubr.f32.gmra.mrb[18].mxu0 %v445_v24 }
 0x1c2   :  { %v433_v25 = vmul.f32 %v365_v22, %v1230_v6  ;;  %876 = vmatprep.mubr.msk.f32.mxu0 %vm971_vm0, %v972_v4  ;;  %vm420_vm2 = vcmp.gt.f32.partialorder %v365_v22, 0.0 }
 0x1c3   :  { %v369_v26 = vpop.f32.mrb[16].mxu1 }
 0x1c4   :  { %v370_v27 = vadd.f32 %v1297_v11, %v369_v26  ;;  %v810_v28 = vpop.f32.mrb[17].mxu1  ;;  %v446_v29 = vsel %vm420_vm2, %v365_v22, %v433_v25 }
 0x1c5   :  { %877 = vmatmul.mubr.f32.gmra.mrb[20].mxu0 %v446_v29 }
 0x1c6   :  { %v434_v30 = vmul.f32 %v370_v27, %v1230_v6  ;;  %879 = vmatprep.mubr.msk.f32.mxu0 %vm971_vm0, %v972_v4  ;;  %vm421_vm3 = vcmp.gt.f32.partialorder %v370_v27, 0.0 }
 0x1c7   :  { %v374_v31 = vpop.f32.mrb[18].mxu1 }
 0x1c8   :  { %v375_v32 = vadd.f32 %v1297_v11, %v374_v31  ;;  %v813_v33 = vpop.f32.mrb[19].mxu1  ;;  %v447_v34 = vsel %vm421_vm3, %v370_v27, %v434_v30 }
 0x1c9   :  { %880 = vmatmul.mubr.f32.gmra.mrb[22].mxu0 %v447_v34 }
 0x1ca   :  { %v435_v35 = vmul.f32 %v375_v32, %v1230_v6  ;;  %882 = vmatprep.mubr.msk.f32.mxu0 %vm971_vm0, %v972_v4  ;;  %vm422_vm4 = vcmp.gt.f32.partialorder %v375_v32, 0.0 }
 0x1cb   :  { %v379_v36 = vpop.f32.mrb[20].mxu1 }
 0x1cc   :  { %v380_v37 = vadd.f32 %v1297_v11, %v379_v36  ;;  %v816_v38 = vpop.f32.mrb[21].mxu1  ;;  %v448_v39 = vsel %vm422_vm4, %v375_v32, %v435_v35 }
 0x1cd   :  { %883 = vmatmul.mubr.f32.gmra.mrb[24].mxu0 %v448_v39 }
 0x1ce   :  { %v436_v40 = vmul.f32 %v380_v37, %v1230_v6  ;;  %885 = vmatprep.mubr.msk.f32.mxu0 %vm971_vm0, %v972_v4  ;;  %vm423_vm5 = vcmp.gt.f32.partialorder %v380_v37, 0.0 }
 0x1cf   :  { %v384_v41 = vpop.f32.mrb[22].mxu1 }
 0x1d0   :  { %v385_v42 = vadd.f32 %v1297_v11, %v384_v41  ;;  %v819_v43 = vpop.f32.mrb[23].mxu1  ;;  %v449_v44 = vsel %vm423_vm5, %v380_v37, %v436_v40 }
 0x1d1   :  { %886 = vmatmul.mubr.f32.gmra.mrb[26].mxu0 %v449_v44 }
 0x1d2   :  { %v437_v45 = vmul.f32 %v385_v42, %v1230_v6  ;;  %888 = vmatprep.mubr.msk.f32.mxu0 %vm971_vm0, %v972_v4  ;;  %vm424_vm6 = vcmp.gt.f32.partialorder %v385_v42, 0.0 }
 0x1d3   :  { %v389_v46 = vpop.f32.mrb[24].mxu1 }
 0x1d4   :  { %v390_v47 = vadd.f32 %v1297_v11, %v389_v46  ;;  %v822_v48 = vpop.f32.mrb[25].mxu1  ;;  %v450_v49 = vsel %vm424_vm6, %v385_v42, %v437_v45 }
 0x1d5   :  { %889 = vmatmul.mubr.f32.gmra.mrb[28].mxu0 %v450_v49 }
 0x1d6   :  { %v438_v50 = vmul.f32 %v390_v47, %v1230_v6  ;;  %891 = vmatprep.mubr.msk.f32.mxu0 %vm971_vm0, %v972_v4  ;;  %vm425_vm7 = vcmp.gt.f32.partialorder %v390_v47, 0.0 }
 0x1d7   :  { %v394_v51 = vpop.f32.mrb[26].mxu1 }
 0x1d8   :  { %v395_v52 = vadd.f32 %v1297_v11, %v394_v51  ;;  %v825_v53 = vpop.f32.mrb[27].mxu1  ;;  %v451_v54 = vsel %vm425_vm7, %v390_v47, %v438_v50 }
 0x1d9   :  { %892 = vmatmul.mubr.f32.gmra.mrb[30].mxu0 %v451_v54 }
 0x1da   :  { %v439_v55 = vmul.f32 %v395_v52, %v1230_v6  ;;  %894 = vmatprep.mubr.msk.f32.mxu0 %vm971_vm0, %v972_v4  ;;  %vm426_vm8 = vcmp.gt.f32.partialorder %v395_v52, 0.0 }
 0x1db   :  { %v399_v56 = vpop.f32.mrb[28].mxu1 }
 0x1dc   :  { %v400_v57 = vadd.f32 %v1297_v11, %v399_v56  ;;  %v828_v58 = vpop.f32.mrb[29].mxu1  ;;  %v452_v59 = vsel %vm426_vm8, %v395_v52, %v439_v55 }
 0x1dd   :  { %895 = vmatmul.mubr.f32.gmra.mrb[32].mxu0 %v452_v59 }
 0x1de   :  { %v440_v60 = vmul.f32 %v400_v57, %v1230_v6  ;;  %897 = vmatprep.mubr.msk.f32.mxu0 %vm971_vm0, %v972_v4  ;;  %vm427_vm9 = vcmp.gt.f32.partialorder %v400_v57, 0.0 }
 0x1df   :  { %v404_v61 = vpop.f32.mrb[30].mxu1 }
 0x1e0   :  { %v405_v62 = vadd.f32 %v1297_v11, %v404_v61  ;;  %v831_v63 = vpop.f32.mrb[31].mxu1  ;;  %v453_v1 = vsel %vm427_vm9, %v400_v57, %v440_v60 }
 0x1e1   :  { %898 = vmatmul.mubr.f32.gmra.mrb[34].mxu0 %v453_v1 }
 0x1e2   :  { %v441_v2 = vmul.f32 %v405_v62, %v1230_v6  ;;  %900 = vmatprep.mubr.msk.f32.mxu0 %vm971_vm0, %v972_v4  ;;  %vm428_vm10 = vcmp.gt.f32.partialorder %v405_v62, 0.0 }
 0x1e3   :  { %v409_v5 = vpop.f32.mrb[32].mxu1 }
 0x1e4   :  { %v410_v7 = vadd.f32 %v1297_v11, %v409_v5  ;;  %v834_v8 = vpop.f32.mrb[33].mxu1  ;;  %v454_v9 = vsel %vm428_vm10, %v405_v62, %v441_v2 }
 0x1e5   :  { %901 = vmatmul.mubr.f32.gmra.mrb[36].mxu0 %v454_v9 }
 0x1e6   :  { %v442_v3 = vmul.f32 %v410_v7, %v1230_v6  ;;  %903 = vmatprep.mubr.msk.f32.mxu0 %vm971_vm0, %v972_v4  ;;  %vm429_vm11 = vcmp.gt.f32.partialorder %v410_v7, 0.0 }
 0x1e7   :  { %v414_v10 = vpop.f32.mrb[34].mxu1 }
 0x1e8   :  { %v415_v0 = vadd.f32 %v1297_v11, %v414_v10  ;;  %v837_v12 = vpop.f32.mrb[35].mxu1  ;;  %v455_v13 = vsel %vm429_vm11, %v410_v7, %v442_v3 }
 0x1e9   :  { %904 = vmatmul.mubr.f32.gmra.mrb[38].mxu0 %v455_v13 }
 0x1ea   :  { %v443_v14 = vmul.f32 %v415_v0, %v1230_v6  ;;  %906 = vmatprep.mubr.msk.f32.mxu0 %vm971_vm0, %v972_v4  ;;  %vm430_vm12 = vcmp.gt.f32.partialorder %v415_v0, 0.0  ;;  %vm623_vm0 = vcmask 125952  }
 0x1ec   :  { %v456_v15 = vsel %vm430_vm12, %v415_v0, %v443_v14 }
 0x1ed   :  { %907 = vmatmul.mubr.f32.gmra.mrb[40].mxu0 %v456_v15 }
 0x290   :  { %v546_v17 = vpop.f32.mrb[16].mxu0 }
 0x291   :  { %v547_v18 = vadd.f32 %v644_v16, %v546_v17  ;;  %v872_v19 = vpop.f32.mrb[17].mxu0 }
 0x293   :  { %611 = vst.msk [vmem:[%s1411_s8] sm:$0xff] %vm610_vm13, %v547_v18 }
 0x294   :  { %v551_v6 = vpop.f32.mrb[18].mxu0 }
 0x295   :  { %v552_v11 = vadd.f32 %v644_v16, %v551_v6  ;;  %v875_v20 = vpop.f32.mrb[19].mxu0 }
 0x297   :  { %612 = vst.msk [vmem:[%s1411_s8 + $0x8] sm:$0xff] %vm610_vm13, %v552_v11 }
 0x298   :  { %v556_v4 = vpop.f32.mrb[20].mxu0 }
 0x299   :  { %v557_v21 = vadd.f32 %v644_v16, %v556_v4  ;;  %v878_v22 = vpop.f32.mrb[21].mxu0 }
 0x29b   :  { %613 = vst.msk [vmem:[%s1411_s8 + $0x10] sm:$0xff] %vm610_vm13, %v557_v21 }
 0x29c   :  { %v561_v23 = vpop.f32.mrb[22].mxu0 }
 0x29d   :  { %v562_v24 = vadd.f32 %v644_v16, %v561_v23  ;;  %v881_v25 = vpop.f32.mrb[23].mxu0 }
 0x29f   :  { %614 = vst.msk [vmem:[%s1411_s8 + $0x18] sm:$0xff] %vm610_vm13, %v562_v24 }
 0x2a0   :  { %v566_v26 = vpop.f32.mrb[24].mxu0 }
 0x2a1   :  { %v567_v27 = vadd.f32 %v644_v16, %v566_v26  ;;  %v884_v28 = vpop.f32.mrb[25].mxu0 }
 0x2a3   :  { %615 = vst.msk [vmem:[%s1411_s8 + $0x20] sm:$0xff] %vm610_vm13, %v567_v27 }
 0x2a4   :  { %v571_v29 = vpop.f32.mrb[26].mxu0 }
 0x2a5   :  { %v572_v30 = vadd.f32 %v644_v16, %v571_v29  ;;  %v887_v31 = vpop.f32.mrb[27].mxu0 }
 0x2a7   :  { %616 = vst.msk [vmem:[%s1411_s8 + $0x28] sm:$0xff] %vm610_vm13, %v572_v30 }
 0x2a8   :  { %v576_v32 = vpop.f32.mrb[28].mxu0 }
 0x2a9   :  { %v577_v33 = vadd.f32 %v644_v16, %v576_v32  ;;  %v890_v34 = vpop.f32.mrb[29].mxu0 }
 0x2ab   :  { %617 = vst.msk [vmem:[%s1411_s8 + $0x30] sm:$0xff] %vm610_vm13, %v577_v33 }
 0x2ac   :  { %v581_v35 = vpop.f32.mrb[30].mxu0 }
 0x2ad   :  { %v582_v36 = vadd.f32 %v644_v16, %v581_v35  ;;  %v893_v37 = vpop.f32.mrb[31].mxu0 }
 0x2af   :  { %618 = vst.msk [vmem:[%s1411_s8 + $0x38] sm:$0xff] %vm610_vm13, %v582_v36 }
 0x2b0   :  { %v586_v38 = vpop.f32.mrb[32].mxu0 }
 0x2b1   :  { %v587_v39 = vadd.f32 %v644_v16, %v586_v38  ;;  %v896_v40 = vpop.f32.mrb[33].mxu0 }
 0x2b3   :  { %619 = vst.msk [vmem:[%s1411_s8 + $0x40] sm:$0xff] %vm610_vm13, %v587_v39 }
 0x2b4   :  { %v591_v41 = vpop.f32.mrb[34].mxu0 }
 0x2b5   :  { %v592_v42 = vadd.f32 %v644_v16, %v591_v41  ;;  %v899_v43 = vpop.f32.mrb[35].mxu0 }
 0x2b7   :  { %620 = vst.msk [vmem:[%s1411_s8 + $0x48] sm:$0xff] %vm610_vm13, %v592_v42 }
 0x2b8   :  { %v596_v44 = vpop.f32.mrb[36].mxu0 }
 0x2b9   :  { %v597_v45 = vadd.f32 %v644_v16, %v596_v44  ;;  %v902_v46 = vpop.f32.mrb[37].mxu0 }
 0x2bb   :  { %621 = vst.msk [vmem:[%s1411_s8 + $0x50] sm:$0xff] %vm610_vm13, %v597_v45 }
 0x2bc   :  { %v601_v47 = vpop.f32.mrb[38].mxu0 }
 0x2bd   :  { %v602_v48 = vadd.f32 %v644_v16, %v601_v47  ;;  %v905_v49 = vpop.f32.mrb[39].mxu0 }
 0x2bf   :  { %622 = vst.msk [vmem:[%s1411_s8 + $0x58] sm:$0xff] %vm610_vm13, %v602_v48 }
 0x2c0   :  { %v606_v50 = vpop.f32.mrb[40].mxu0 }
 0x2c1   :  { %v607_v51 = vadd.f32 %v644_v16, %v606_v50  ;;  %v908_v52 = vpop.f32.mrb[41].mxu0 }
 0x2c3   :  { %624 = vst.msk [vmem:[%s1411_s8 + $0x60] sm:$0xf] %vm623_vm0, %v607_v51 }

</bundles_post_ra>
